<compile_context>
chip_gen: v5e
topology: v5e:2x2
jax: 0.10.0
libtpu: 0.0.40
codegen_flags: <defaults>
</compile_context>

<pallas_src>
import functools

import jax
import jax.numpy as jnp
from jax.experimental import pallas as pl
from jax.experimental.pallas import tpu as pltpu

KERNEL_SET = (2, 3, 6, 7)
MAX_K = max(KERNEL_SET)  # 7


# ----------------------------- Pallas kernel ------------------------------ #
def tcn_kernel(x_ref, w_ref, b_ref, o_ref, *, half):
    """Fused DilatedInception(filter|gate) + tanh*sigmoid as one MXU matmul.

    x_ref : (tm, W*C_in)      bf16 input slab (time-major, channel-minor)
    w_ref : (W*C_in, 2*half)  bf16 block-banded weights; cols [0:half) filter,
                              [half:2*half) gate
    b_ref : (1, 2*half)       f32 bias (tiled over output time steps)
    o_ref : (tm, half)        bf16 gated output slab, half = end_dim*C_out
    """
    acc = jnp.dot(x_ref[...], w_ref[...], preferred_element_type=jnp.float32)
    acc = acc + b_ref[...]
    filt = acc[:, :half]                     # lane slice at a 128-multiple -> free
    gate = acc[:, half:]
    # sigmoid(g) == 0.5*(tanh(g/2)+1): single EUP op instead of exp + reciprocal.
    gated = jnp.tanh(filt) * (0.5 * (jnp.tanh(0.5 * gate) + 1.0))
    o_ref[...] = gated.astype(o_ref.dtype)


# ------------------------------- wrapper ----------------------------------- #
def _round_up(a, b):
    return ((a + b - 1) // b) * b


@functools.partial(jax.jit, static_argnames=("end_dim", "c_out", "tm_cap"))
def temporal_mixer_tcn(x, w_big, b_big, *, end_dim, c_out, tm_cap=512):
    """x: (B, C_in, N, T) NCHW.  Returns (B, C_out, N, end_dim) in bf16."""
    B, C_in, N, T = x.shape
    w_len = end_dim + MAX_K - 1              # only input steps the conv touches
    assert T >= w_len, "begin_dim too small for end_dim slice"
    M = B * N
    K = w_len * C_in
    half = end_dim * c_out
    assert w_big.shape == (K, 2 * half)

    # One grid step when M fits in a single tile; otherwise 512-row tiles.
    tm = _round_up(M, 8) if M <= tm_cap else tm_cap
    m_pad = _round_up(M, tm)

    # NCHW -> last-W time window -> (M, W*C_in) bf16 slab (fused by XLA under jit).
    x_slab = jnp.transpose(x[..., T - w_len:], (0, 2, 3, 1)).reshape(M, K)
    x_slab = x_slab.astype(jnp.bfloat16)
    if m_pad != M:
        x_slab = jnp.pad(x_slab, ((0, m_pad - M), (0, 0)))

    cost = pl.CostEstimate(
        flops=2 * m_pad * K * 2 * half,
        transcendentals=2 * m_pad * half,
        bytes_accessed=(m_pad * K * 2            # x (bf16)
                        + K * 2 * half * 2       # fused weights (bf16)
                        + 2 * half * 4           # bias (f32)
                        + m_pad * half * 2),     # output (bf16)
    )

    out = pl.pallas_call(
        functools.partial(tcn_kernel, half=half),
        out_shape=jax.ShapeDtypeStruct((m_pad, half), jnp.bfloat16),
        grid_spec=pltpu.PrefetchScalarGridSpec(
            num_scalar_prefetch=0,
            grid=(m_pad // tm,),
            in_specs=[
                pl.BlockSpec((tm, K), lambda i: (i, 0)),              # x tile
                pl.BlockSpec((K, 2 * half), lambda i: (0, 0),
                             pipeline_mode=pl.Buffered(1)),           # resident W
                pl.BlockSpec((1, 2 * half), lambda i: (0, 0),
                             pipeline_mode=pl.Buffered(1)),           # resident b
            ],
            out_specs=pl.BlockSpec((tm, half), lambda i: (i, 0)),
        ),
        compiler_params=pltpu.CompilerParams(
            dimension_semantics=("parallel",),
            vmem_limit_bytes=32 * 1024 * 1024,
        ),
        cost_estimate=cost,
    )(x_slab, w_big.astype(jnp.bfloat16), b_big.astype(jnp.float32))

    out = out[:M].reshape(B, N, end_dim, c_out)
    return jnp.transpose(out, (0, 3, 1, 2))


# --------------------- parameter setup / packing (glue) -------------------- #
def init_inception_params(key, c_in, c_out_total):
    """Per-branch weights shaped like nn.Conv2d: (cout_b, c_in, 1, kern)."""
    c_out_b = c_out_total // len(KERNEL_SET)
    params = []
    for kern in KERNEL_SET:
        key, k1, k2 = jax.random.split(key, 3)
        w = 0.1 * jax.random.normal(k1, (c_out_b, c_in, 1, kern), jnp.float32)
        b = 0.1 * jax.random.normal(k2, (c_out_b,), jnp.float32)
        params.append((w, b))
    return params


def pack_inception(params, c_in, c_out_total):
    """Pack branch weights into end-aligned taps (MAX_K, C_in, C_out) + (C_out,)."""
    c_out_b = c_out_total // len(KERNEL_SET)
    wp = jnp.zeros((MAX_K, c_in, c_out_total), jnp.float32)
    bp = jnp.zeros((c_out_total,), jnp.float32)
    for bi, ((w, b), kern) in enumerate(zip(params, KERNEL_SET)):
        off = bi * c_out_b
        w_t = jnp.transpose(w[:, :, 0, :], (2, 1, 0))  # (kern, c_in, cout_b)
        wp = wp.at[MAX_K - kern:, :, off:off + c_out_b].set(w_t)
        bp = bp.at[off:off + c_out_b].set(b)
    return wp, bp


def expand_banded(wp, end_dim):
    """End-aligned taps (MAX_K, C_in, C_out) -> banded (W*C_in, end_dim*C_out).

    W = end_dim + MAX_K - 1 is the only input window any output reads, so the
    all-zero leading rows of the full-T band are trimmed away:
      Band[(t_out+k)*C_in + c, t_out*C_out + d] = wp[k, c, d], else 0.
    """
    _, c_in, c_out = wp.shape
    w_len = end_dim + MAX_K - 1
    band = jnp.zeros((w_len, c_in, end_dim, c_out), jnp.float32)
    for t_out in range(end_dim):
        for k in range(MAX_K):
            band = band.at[t_out + k, :, t_out, :].set(wp[k])
    return band.reshape(w_len * c_in, end_dim * c_out)


def build_fused_weights(f_params, g_params, c_in, c_out, end_dim):
    """Fuse filter + gate into (W*C_in, 2*end_dim*C_out) weights + (1, 2*end_dim*C_out) bias."""
    wf, bf = pack_inception(f_params, c_in, c_out)
    wg, bg = pack_inception(g_params, c_in, c_out)
    w_big = jnp.concatenate([expand_banded(wf, end_dim),
                             expand_banded(wg, end_dim)], axis=1)
    b_big = jnp.concatenate([jnp.tile(bf, end_dim), jnp.tile(bg, end_dim)])
    return w_big, b_big.reshape(1, -1)


# ------------------------ pure-JAX reference (check) ----------------------- #
def dilated_inception_ref(x, params):
    outs = []
    for (w, b), kern in zip(params, KERNEL_SET):
        y = jax.lax.conv_general_dilated(
            x, w, window_strides=(1, 1), padding="VALID",
            dimension_numbers=("NCHW", "OIHW", "NCHW"))
        outs.append(y + b[None, :, None, None])
    L = outs[-1].shape[3]
    outs = [o[..., -L:] for o in outs]
    return jnp.concatenate(outs, axis=1)


def temporal_mixer_ref(x, f_params, g_params, end_dim):
    filt = jnp.tanh(dilated_inception_ref(x, f_params))
    gate = jax.nn.sigmoid(dilated_inception_ref(x, g_params))
    return (filt * gate)[..., -end_dim:]


def _q_bf16(a):
    return a.astype(jnp.bfloat16).astype(jnp.float32)


# ---------------------------------- main ----------------------------------- #
if __name__ == "__main__":
    # Module config (TCN branch); the nn.Dropout layer is defined but unused in forward.
    B, N = 2, 64
    residual_channels = 32       # C_in
    conv_channels = 32           # C_out (4 branches x 8)
    begin_dim = 16               # T
    end_dim = 8

    key = jax.random.PRNGKey(0)
    kx, kf, kg = jax.random.split(key, 3)
    x = jax.random.normal(kx, (B, residual_channels, N, begin_dim), jnp.float32)

    f_params = init_inception_params(kf, residual_channels, conv_channels)
    g_params = init_inception_params(kg, residual_channels, conv_channels)
    w_big, b_big = build_fused_weights(
        f_params, g_params, residual_channels, conv_channels, end_dim)

    out = temporal_mixer_tcn(x, w_big, b_big,
                             end_dim=end_dim, c_out=conv_channels)
    out = jax.block_until_ready(out)

    # Reference with the same bf16 input/weight quantization as the kernel path.
    f_params_q = [(_q_bf16(w), b) for (w, b) in f_params]
    g_params_q = [(_q_bf16(w), b) for (w, b) in g_params]
    ref = temporal_mixer_ref(_q_bf16(x), f_params_q, g_params_q, end_dim)

    assert out.shape == (B, conv_channels, N, end_dim), out.shape
    out_f32 = out.astype(jnp.float32)
    err = float(jnp.max(jnp.abs(out_f32 - ref)))
    # Output is bf16 -> ~2^-9 absolute rounding on values in (-1, 1).
    assert jnp.allclose(out_f32, ref, atol=8e-3, rtol=2e-2), err

    # TODO(synk): other temporal_func branches ('Seasonal' rfft/irfft, 'GRU',
    # 'Attention', 'MLP') are not implemented here; only the 'TCN' path is.
    print("KERNEL_OK")
</pallas_src>

<mosaic_0001>
module attributes {stable_mosaic.version = 11 : i64} {
  func.func @tcn_kernel(%arg0: i32, %arg1: memref<128x448xbf16, #tpu.memory_space<vmem>>, %arg2: memref<448x512xbf16, #tpu.memory_space<vmem>>, %arg3: memref<1x512xf32, #tpu.memory_space<vmem>>, %arg4: memref<128x256xbf16, #tpu.memory_space<vmem>>) attributes {dimension_semantics = [#tpu.dimension_semantics<parallel>], iteration_bounds = array<i64: 1>, scalar_prefetch = 0 : i64, scratch_operands = 0 : i64, tpu.core_type = #tpu.core_type<tc>, window_params = [{transform_indices = @transform_0, window_bounds = array<i64: 128, 448>}, {pipeline_mode = #tpu.pipeline_mode<synchronous>, transform_indices = @transform_1, window_bounds = array<i64: 448, 512>}, {pipeline_mode = #tpu.pipeline_mode<synchronous>, transform_indices = @transform_2, window_bounds = array<i64: 1, 512>}, {transform_indices = @transform_3, window_bounds = array<i64: 128, 256>}]} {
    %c0 = arith.constant 0 : index
    %c0_0 = arith.constant 0 : index
    %0 = vector.load %arg1[%c0, %c0_0] : memref<128x448xbf16, #tpu.memory_space<vmem>>, vector<128x448xbf16>
    %c0_1 = arith.constant 0 : index
    %c0_2 = arith.constant 0 : index
    %1 = vector.load %arg2[%c0_1, %c0_2] : memref<448x512xbf16, #tpu.memory_space<vmem>>, vector<448x512xbf16>
    %cst = arith.constant dense<0.000000e+00> : vector<128x512xf32>
    %2 = tpu.matmul %0, %1, %cst {dimension_numbers = #tpu.dot_dimension_numbers<[1], [0], [0], [1], [0, 0, 1, 1], [], []>} : vector<128x448xbf16>, vector<448x512xbf16>, vector<128x512xf32> -> vector<128x512xf32>
    %c0_3 = arith.constant 0 : index
    %c0_4 = arith.constant 0 : index
    %3 = vector.load %arg3[%c0_3, %c0_4] : memref<1x512xf32, #tpu.memory_space<vmem>>, vector<1x512xf32>
    %4 = vector.broadcast %3 : vector<1x512xf32> to vector<128x512xf32>
    %5 = arith.addf %2, %4 : vector<128x512xf32>
    %6 = vector.extract_strided_slice %5 {offsets = [0, 0], sizes = [128, 256], strides = [1, 1]} : vector<128x512xf32> to vector<128x256xf32>
    %7 = vector.extract_strided_slice %5 {offsets = [0, 256], sizes = [128, 256], strides = [1, 1]} : vector<128x512xf32> to vector<128x256xf32>
    %8 = math.tanh %6 : vector<128x256xf32>
    %cst_5 = arith.constant 5.000000e-01 : f32
    %9 = vector.broadcast %cst_5 : f32 to vector<128x256xf32>
    %10 = arith.mulf %9, %7 : vector<128x256xf32>
    %11 = math.tanh %10 : vector<128x256xf32>
    %cst_6 = arith.constant 1.000000e+00 : f32
    %12 = vector.broadcast %cst_6 : f32 to vector<128x256xf32>
    %13 = arith.addf %11, %12 : vector<128x256xf32>
    %cst_7 = arith.constant 5.000000e-01 : f32
    %14 = vector.broadcast %cst_7 : f32 to vector<128x256xf32>
    %15 = arith.mulf %14, %13 : vector<128x256xf32>
    %16 = arith.mulf %8, %15 : vector<128x256xf32>
    %17 = arith.truncf %16 : vector<128x256xf32> to vector<128x256xbf16>
    %c0_8 = arith.constant 0 : index
    %c0_9 = arith.constant 0 : index
    %18 = vector.load %arg4[%c0_8, %c0_9] : memref<128x256xbf16, #tpu.memory_space<vmem>>, vector<128x256xbf16>
    tpu.vector_store %arg4[%c0_8, %c0_9], %17 {strides = array<i32>} : memref<128x256xbf16, #tpu.memory_space<vmem>>, vector<128x256xbf16>,
    return
  }
  func.func @transform_0(%arg0: i32) -> (i32, i32) {
    %c0_i32 = arith.constant 0 : i32
    %c0_i32_0 = arith.constant 0 : i32
    return %arg0, %c0_i32 : i32, i32
  }
  func.func @transform_1(%arg0: i32) -> (i32, i32) {
    %c0_i32 = arith.constant 0 : i32
    %c0_i32_0 = arith.constant 0 : i32
    %c0_i32_1 = arith.constant 0 : i32
    return %c0_i32, %c0_i32_0 : i32, i32
  }
  func.func @transform_2(%arg0: i32) -> (i32, i32) {
    %c0_i32 = arith.constant 0 : i32
    %c0_i32_0 = arith.constant 0 : i32
    %c0_i32_1 = arith.constant 0 : i32
    return %c0_i32, %c0_i32_0 : i32, i32
  }
  func.func @transform_3(%arg0: i32) -> (i32, i32) {
    %c0_i32 = arith.constant 0 : i32
    %c0_i32_0 = arith.constant 0 : i32
    return %arg0, %c0_i32 : i32, i32
  }
}

</mosaic_0001>

<bundles_post_ra>
// kernel: temporal_mixer_tcn.1
= control target key start
LH: loop header
LB: loop body
LE: loop exit
PB: predicated region body
PF: predicated region fallthrough
CT: control target
= control target key end

     0   :  { %vm881_vm0 = vcmask 523264   ;;  %s4185_s1 = inlined_call_operand.vmem [shape: bf16[448,512], index: 1, kind: input, shape index: {}]   ;;  %s4186_s0 = inlined_call_operand.vmem [shape: bf16[128,448], index: 0, kind: input, shape index: {}]   ;;  %s4187_s2 = inlined_call_operand.vmem [shape: f32[1,512], index: 2, kind: input, shape index: {}]   ;;  %s4188_s3 = inlined_call_operand.vmem [shape: bf16[128,256], index: 3, kind: output, shape index: {}]  }
   0x1   :  { %v2160_v0 = vld [vmem:[%s4185_s1 + $0xe0] sm:$0xf]  ;;  %v2588_v1 = vld [vmem:[%s4185_s1 + $0xec] sm:$0xf0]  ;;  %v2527_v54 = vld [vmem:[%s4186_s0 + $0xc] sm:$0xf] }
   0x2   :  { %v2288_v2 = vld [vmem:[%s4185_s1 + $0x1e0] sm:$0xf]  ;;  %v2161_v3 = vor.u32 %v2588_v1, %v2160_v0  ;;  %v2620_v4 = vld [vmem:[%s4185_s1 + $0x1ec] sm:$0xf0]  ;;  %v1930_v55 = vld [vmem:[%s4186_s0 + $0x18] sm:$0xf0] }
   0x3   :  { %v2416_v5 = vld [vmem:[%s4185_s1 + $0x2e0] sm:$0xf]  ;;  %v2652_v6 = vld [vmem:[%s4185_s1 + $0x2ec] sm:$0xf0]  ;;  %v2289_v7 = vor.u32 %v2620_v4, %v2288_v2  ;;  %v2954_v0 = vor.u32 %v2527_v54, %v1930_v55  ;;  %v2586_v2 = vld [vmem:[%s4185_s1 + $0xe4] sm:$0xf] }
   0x4   :  { %v2417_v8 = vor.u32 %v2652_v6, %v2416_v5  ;;  %v2480_v9 = vld [vmem:[%s4185_s1 + $0x360] sm:$0xf]  ;;  %v2668_v10 = vld [vmem:[%s4185_s1 + $0x36c] sm:$0xf0]  ;;  %906 = vmatpush.bf16.msra.mxu0 %v2161_v3  ;;  %v2162_v3 = vld [vmem:[%s4185_s1 + $0xf0] sm:$0xf0] }
   0x5   :  { %v2144_v11 = vld [vmem:[%s4185_s1 + $0xc0] sm:$0xf]  ;;  %v2481_v12 = vor.u32 %v2668_v10, %v2480_v9  ;;  %v2584_v13 = vld [vmem:[%s4185_s1 + $0xcc] sm:$0xf0]  ;;  %955 = vmatpush.bf16.msra.mxu1 %v2289_v7  ;;  %v2165_v4 = vor.u32 %v2586_v2, %v2162_v3  ;;  %v2402_v54 = vld [vmem:[%s4185_s1 + $0x2d0] sm:$0xf0] }
   0x6   :  { %v2272_v14 = vld [vmem:[%s4185_s1 + $0x1c0] sm:$0xf]  ;;  %v2616_v15 = vld [vmem:[%s4185_s1 + $0x1cc] sm:$0xf0]  ;;  %1004 = vmatpush.bf16.msra.mxu2 %v2417_v8  ;;  %v2145_v16 = vor.u32 %v2584_v13, %v2144_v11  ;;  %v2386_v3 = vld [vmem:[%s4185_s1 + $0x2b0] sm:$0xf0] }
   0x7   :  { %v2273_v17 = vor.u32 %v2616_v15, %v2272_v14  ;;  %v2400_v18 = vld [vmem:[%s4185_s1 + $0x2c0] sm:$0xf]  ;;  %v2648_v19 = vld [vmem:[%s4185_s1 + $0x2cc] sm:$0xf0]  ;;  %1057 = vmatpush.bf16.msra.mxu3 %v2481_v12 }
   0x8   :  { %v2464_v20 = vld [vmem:[%s4185_s1 + $0x340] sm:$0xf]  ;;  %v2401_v21 = vor.u32 %v2648_v19, %v2400_v18  ;;  %v2664_v22 = vld [vmem:[%s4185_s1 + $0x34c] sm:$0xf0]  ;;  %907 = vmatpush.bf16.msra.mxu0 %v2145_v16 }
   0x9   :  { %v2128_v23 = vld [vmem:[%s4185_s1 + $0xa0] sm:$0xf]  ;;  %v2580_v24 = vld [vmem:[%s4185_s1 + $0xac] sm:$0xf0]  ;;  %v2465_v25 = vor.u32 %v2664_v22, %v2464_v20  ;;  %956 = vmatpush.bf16.msra.mxu1 %v2273_v17 }
   0xa   :  { %v2256_v26 = vld [vmem:[%s4185_s1 + $0x1a0] sm:$0xf]  ;;  %v2612_v27 = vld [vmem:[%s4185_s1 + $0x1ac] sm:$0xf0]  ;;  %v2129_v29 = vor.u32 %v2580_v24, %v2128_v23  ;;  %1005 = vmatpush.bf16.msra.mxu2 %v2401_v21  ;;  %v2582_v23 = vld [vmem:[%s4185_s1 + $0xc4] sm:$0xf] }
   0xb   :  { %v2384_v28 = vld [vmem:[%s4185_s1 + $0x2a0] sm:$0xf]  ;;  %v2644_v30 = vld [vmem:[%s4185_s1 + $0x2ac] sm:$0xf0]  ;;  %v2257_v33 = vor.u32 %v2612_v27, %v2256_v26  ;;  %1058 = vmatpush.bf16.msra.mxu3 %v2465_v25  ;;  %v2666_v26 = vld [vmem:[%s4185_s1 + $0x364] sm:$0xf] }
   0xc   :  { %v2448_v31 = vld [vmem:[%s4185_s1 + $0x320] sm:$0xf]  ;;  %v2660_v32 = vld [vmem:[%s4185_s1 + $0x32c] sm:$0xf0]  ;;  %v2385_v34 = vor.u32 %v2644_v30, %v2384_v28  ;;  %908 = vmatpush.bf16.msra.mxu0 %v2129_v29  ;;  %v2146_v27 = vld [vmem:[%s4185_s1 + $0xd0] sm:$0xf0] }
   0xd   :  { %v2112_v35 = vld [vmem:[%s4185_s1 + $0x80] sm:$0xf]  ;;  %v2576_v36 = vld [vmem:[%s4185_s1 + $0x8c] sm:$0xf0]  ;;  %v2449_v38 = vor.u32 %v2660_v32, %v2448_v31  ;;  %957 = vmatpush.bf16.msra.mxu1 %v2257_v33  ;;  %v2482_v28 = vld [vmem:[%s4185_s1 + $0x370] sm:$0xf0]  ;;  %v2149_v31 = vor.u32 %v2582_v23, %v2146_v27 }
   0xe   :  { %v2240_v37 = vld [vmem:[%s4185_s1 + $0x180] sm:$0xf]  ;;  %v2608_v39 = vld [vmem:[%s4185_s1 + $0x18c] sm:$0xf0]  ;;  %v2113_v44 = vor.u32 %v2576_v36, %v2112_v35  ;;  %1006 = vmatpush.bf16.msra.mxu2 %v2385_v34  ;;  %v2618_v29 = vld [vmem:[%s4185_s1 + $0x1e4] sm:$0xf] }
   0xf   :  { %v2368_v40 = vld [vmem:[%s4185_s1 + $0x280] sm:$0xf]  ;;  %v2640_v41 = vld [vmem:[%s4185_s1 + $0x28c] sm:$0xf0]  ;;  %v2241_v45 = vor.u32 %v2608_v39, %v2240_v37  ;;  %1059 = vmatpush.bf16.msra.mxu3 %v2449_v38  ;;  %v2290_v30 = vld [vmem:[%s4185_s1 + $0x1f0] sm:$0xf0] }
  0x10   :  { %v2432_v42 = vld [vmem:[%s4185_s1 + $0x300] sm:$0xf]  ;;  %v2656_v43 = vld [vmem:[%s4185_s1 + $0x30c] sm:$0xf0]  ;;  %v2369_v46 = vor.u32 %v2640_v41, %v2368_v40  ;;  %909 = vmatpush.bf16.msra.mxu0 %v2113_v44  ;;  %v2526_v33 = vld [vmem:[%s4186_s0 + $0x4] sm:$0xf]  ;;  %v2485_v41 = vor.u32 %v2666_v26, %v2482_v28 }
  0x11   :  { %v2096_v47 = vld [vmem:[%s4185_s1 + $0x60] sm:$0xf]  ;;  %v2572_v48 = vld [vmem:[%s4185_s1 + $0x6c] sm:$0xf0]  ;;  %v2433_v50 = vor.u32 %v2656_v43, %v2432_v42  ;;  %958 = vmatpush.bf16.msra.mxu1 %v2241_v45  ;;  %v2650_v34 = vld [vmem:[%s4185_s1 + $0x2e4] sm:$0xf]  ;;  %v2293_v43 = vor.u32 %v2618_v29, %v2290_v30 }
  0x12   :  { %v2224_v49 = vld [vmem:[%s4185_s1 + $0x160] sm:$0xf]  ;;  %v2604_v51 = vld [vmem:[%s4185_s1 + $0x16c] sm:$0xf0]  ;;  %v2097_v56 = vor.u32 %v2572_v48, %v2096_v47  ;;  %1007 = vmatpush.bf16.msra.mxu2 %v2369_v46  ;;  %v2418_v35 = vld [vmem:[%s4185_s1 + $0x2f0] sm:$0xf0] }
  0x13   :  { %v2352_v52 = vld [vmem:[%s4185_s1 + $0x260] sm:$0xf]  ;;  %v2636_v53 = vld [vmem:[%s4185_s1 + $0x26c] sm:$0xf0]  ;;  %v2225_v59 = vor.u32 %v2604_v51, %v2224_v49  ;;  %1060 = vmatpush.bf16.msra.mxu3 %v2433_v50  ;;  %v1922_v38 = vld [vmem:[%s4186_s0 + $0x10] sm:$0xf0]  ;;  %v2421_v48 = vor.u32 %v2650_v34, %v2418_v35 }
  0x14   :  { %v2080_v57 = vld [vmem:[%s4185_s1 + $0x40] sm:$0xf]  ;;  %v2568_v58 = vld [vmem:[%s4185_s1 + $0x4c] sm:$0xf0]  ;;  %v2353_v60 = vor.u32 %v2636_v53, %v2352_v52  ;;  %910 = vmatpush.bf16.msra.mxu0 %v2097_v56  ;;  %v1928_v39 = vld [vmem:[%s4186_s0 + $0x8] sm:$0xf]  ;;  %v3065_v51 = vor.u32 %v2526_v33, %v1922_v38 }
  0x15   :  { %v2208_v61 = vld [vmem:[%s4185_s1 + $0x140] sm:$0xf]  ;;  %v2600_v62 = vld [vmem:[%s4185_s1 + $0x14c] sm:$0xf0]  ;;  %v2081_v5 = vor.u32 %v2568_v58, %v2080_v57  ;;  %959 = vmatpush.bf16.msra.mxu1 %v2225_v59  ;;  %v2529_v40 = vld [vmem:[%s4186_s0 + $0x14] sm:$0xf0] }
  0x16   :  { %v2336_v63 = vld [vmem:[%s4185_s1 + $0x240] sm:$0xf]  ;;  %v2632_v1 = vld [vmem:[%s4185_s1 + $0x24c] sm:$0xf0]  ;;  %1008 = vmatpush.bf16.msra.mxu2 %v2353_v60  ;;  %v2209_v6 = vor.u32 %v2600_v62, %v2208_v61  ;;  %2494 = vmatmul.msk.bf16.vlgmr.msra.gmra.mxu3 %vm881_vm0, %v2954_v0  ;;  %v2531_v42 = vld [vmem:[%s4186_s0 + $0x2c] sm:$0xf]  ;;  %v3067_v52 = vor.u32 %v2529_v40, %v1928_v39 }
  0x17   :  { %v2337_v7 = vor.u32 %v2632_v1, %v2336_v63  ;;  %v2064_v8 = vld [vmem:[%s4185_s1 + $0x20] sm:$0xf]  ;;  %v2564_v9 = vld [vmem:[%s4185_s1 + $0x2c] sm:$0xf0]  ;;  %1102 = vmatpush.bf16.msrb.mxu3 %v2165_v4  ;;  %v2578_v44 = vld [vmem:[%s4185_s1 + $0xa4] sm:$0xf] }
  0x18   :  { %v2192_v10 = vld [vmem:[%s4185_s1 + $0x120] sm:$0xf]  ;;  %v2596_v11 = vld [vmem:[%s4185_s1 + $0x12c] sm:$0xf0]  ;;  %911 = vmatpush.bf16.msra.mxu0 %v2081_v5  ;;  %v2065_v15 = vor.u32 %v2564_v9, %v2064_v8  ;;  %v2130_v45 = vld [vmem:[%s4185_s1 + $0xb0] sm:$0xf0] }
  0x19   :  { %v2320_v12 = vld [vmem:[%s4185_s1 + $0x220] sm:$0xf]  ;;  %v2628_v13 = vld [vmem:[%s4185_s1 + $0x22c] sm:$0xf0]  ;;  %960 = vmatpush.bf16.msra.mxu1 %v2209_v6  ;;  %v2193_v19 = vor.u32 %v2596_v11, %v2192_v10  ;;  %v1946_v47 = vld [vmem:[%s4186_s0 + $0x38] sm:$0xf0]  ;;  %v2133_v55 = vor.u32 %v2578_v44, %v2130_v45 }
  0x1a   :  { %v2048_v14 = vld [vmem:[%s4185_s1] sm:$0xf]  ;;  %v2560_v16 = vld [vmem:[%s4185_s1 + $0xc] sm:$0xf0]  ;;  %1009 = vmatpush.bf16.msra.mxu2 %v2337_v7  ;;  %v2321_v20 = vor.u32 %v2628_v13, %v2320_v12  ;;  %v2614_v49 = vld [vmem:[%s4185_s1 + $0x1c4] sm:$0xf]  ;;  %v3075_v56 = vor.u32 %v2531_v42, %v1946_v47 }
  0x1b   :  { %v2176_v17 = vld [vmem:[%s4185_s1 + $0x100] sm:$0xf]  ;;  %v2592_v18 = vld [vmem:[%s4185_s1 + $0x10c] sm:$0xf0]  ;;  %v2049_v32 = vor.u32 %v2560_v16, %v2048_v14  ;;  %1103 = vmatpush.bf16.msrb.mxu3 %v2149_v31  ;;  %v2274_v50 = vld [vmem:[%s4185_s1 + $0x1d0] sm:$0xf0] }
  0x1c   :  { %v2304_v21 = vld [vmem:[%s4185_s1 + $0x200] sm:$0xf]  ;;  %v2624_v22 = vld [vmem:[%s4185_s1 + $0x20c] sm:$0xf0]  ;;  %912 = vmatpush.bf16.msra.mxu0 %v2065_v15  ;;  %v2177_v36 = vor.u32 %v2592_v18, %v2176_v17  ;;  %v2646_v53 = vld [vmem:[%s4185_s1 + $0x2c4] sm:$0xf]  ;;  %v2277_v57 = vor.u32 %v2614_v49, %v2274_v50 }
  0x1d   :  { %v1920_v24 = vld [vmem:[%s4186_s0] sm:$0xf]  ;;  %v2528_v25 = vld [vmem:[%s4186_s0 + $0xc] sm:$0xf0]  ;;  %961 = vmatpush.bf16.msra.mxu1 %v2193_v19  ;;  %v2305_v37 = vor.u32 %v2624_v22, %v2304_v21  ;;  %v2405_v58 = vor.u32 %v2646_v53, %v2402_v54  ;;  %v2662_v59 = vld [vmem:[%s4185_s1 + $0x344] sm:$0xf] }
  0x1e   :  { %1010 = vmatpush.bf16.msra.mxu2 %v2321_v20  ;;  %v3054_v46 = vor.u32 %v2528_v25, %v1920_v24  ;;  %v2466_v60 = vld [vmem:[%s4185_s1 + $0x350] sm:$0xf0]  ;;  %v2610_v62 = vld [vmem:[%s4185_s1 + $0x1a4] sm:$0xf]  ;;  %v1936_v8 = vld [vmem:[%s4186_s0 + $0x20] sm:$0xf] }
  0x1f   :  { %1104 = vmatpush.bf16.msrb.mxu3 %v2133_v55  ;;  %v2469_v61 = vor.u32 %v2662_v59, %v2466_v60  ;;  %v2258_v63 = vld [vmem:[%s4185_s1 + $0x1b0] sm:$0xf0]  ;;  %v2642_v1 = vld [vmem:[%s4185_s1 + $0x2a4] sm:$0xf]  ;;  %v2532_v9 = vld [vmem:[%s4186_s0 + $0x2c] sm:$0xf0] }
  0x20   :  { %913 = vmatpush.bf16.msra.mxu0 %v2049_v32  ;;  %v2261_v2 = vor.u32 %v2610_v62, %v2258_v63  ;;  %v2574_v4 = vld [vmem:[%s4185_s1 + $0x84] sm:$0xf]  ;;  %v2114_v5 = vld [vmem:[%s4185_s1 + $0x90] sm:$0xf0]  ;;  %v2389_v6 = vor.u32 %v2642_v1, %v2386_v3  ;;  %v1944_v12 = vld [vmem:[%s4186_s0 + $0x28] sm:$0xf]  ;;  %v3124_v14 = vor.u32 %v2532_v9, %v1936_v8 }
  0x21   :  { %962 = vmatpush.bf16.msra.mxu1 %v2177_v36  ;;  %v2117_v7 = vor.u32 %v2574_v4, %v2114_v5  ;;  %v2530_v10 = vld [vmem:[%s4186_s0 + $0x24] sm:$0xf]  ;;  %v1938_v11 = vld [vmem:[%s4186_s0 + $0x30] sm:$0xf0]  ;;  %v2533_v13 = vld [vmem:[%s4186_s0 + $0x34] sm:$0xf0] }
  0x22   :  { %1011 = vmatpush.bf16.msra.mxu2 %v2305_v37  ;;  %v2535_v15 = vld [vmem:[%s4186_s0 + $0x4c] sm:$0xf]  ;;  %v1962_v16 = vld [vmem:[%s4186_s0 + $0x58] sm:$0xf0]  ;;  %v3132_v17 = vor.u32 %v2530_v10, %v1938_v11  ;;  %v3134_v18 = vor.u32 %v2533_v13, %v1944_v12  ;;  %v2606_v20 = vld [vmem:[%s4185_s1 + $0x184] sm:$0xf] }
  0x23   :  { %914 = vmatmul.bf16.vlgmr.msra.gmra.mxu0 %v3054_v46  ;;  %1105 = vmatpush.bf16.msrb.mxu3 %v2117_v7  ;;  %v3136_v19 = vor.u32 %v2535_v15, %v1962_v16  ;;  %v2242_v21 = vld [vmem:[%s4185_s1 + $0x190] sm:$0xf0]  ;;  %v2638_v22 = vld [vmem:[%s4185_s1 + $0x284] sm:$0xf]  ;;  %v1952_v29 = vld [vmem:[%s4186_s0 + $0x40] sm:$0xf] }
  0x24   :  { %1151 = vmatpush.bf16.msrb.mxu0 %v2293_v43  ;;  %963 = vmatmul.bf16.vlgmr.msra.gmra.mxu1 %v3065_v51  ;;  %v2245_v23 = vor.u32 %v2606_v20, %v2242_v21  ;;  %v2370_v24 = vld [vmem:[%s4185_s1 + $0x290] sm:$0xf0]  ;;  %v2570_v25 = vld [vmem:[%s4185_s1 + $0x64] sm:$0xf]  ;;  %v2536_v30 = vld [vmem:[%s4186_s0 + $0x4c] sm:$0xf0] }
  0x25   :  { %1200 = vmatpush.bf16.msrb.mxu1 %v2421_v48  ;;  %1012 = vmatmul.bf16.vlgmr.msra.gmra.mxu2 %v3067_v52  ;;  %v2098_v26 = vld [vmem:[%s4185_s1 + $0x70] sm:$0xf0]  ;;  %v2373_v27 = vor.u32 %v2638_v22, %v2370_v24  ;;  %v2534_v31 = vld [vmem:[%s4186_s0 + $0x44] sm:$0xf]  ;;  %v1960_v33 = vld [vmem:[%s4186_s0 + $0x48] sm:$0xf]  ;;  %v3179_v35 = vor.u32 %v2536_v30, %v1952_v29 }
  0x26   :  { %1253 = vmatpush.bf16.msrb.mxu2 %v2485_v41  ;;  %2495 = vmatmul.msk.bf16.gmra.mxu3 %vm881_vm0, %v3075_v56  ;;  %v2101_v28 = vor.u32 %v2570_v25, %v2098_v26  ;;  %v1954_v32 = vld [vmem:[%s4186_s0 + $0x50] sm:$0xf0]  ;;  %v2537_v34 = vld [vmem:[%s4186_s0 + $0x54] sm:$0xf0]  ;;  %v2539_v36 = vld [vmem:[%s4186_s0 + $0x6c] sm:$0xf] }
  0x27   :  { %v1978_v37 = vld [vmem:[%s4186_s0 + $0x78] sm:$0xf0]  ;;  %v3187_v38 = vor.u32 %v2534_v31, %v1954_v32  ;;  %v3189_v39 = vor.u32 %v2537_v34, %v1960_v33  ;;  %v2658_v41 = vld [vmem:[%s4185_s1 + $0x324] sm:$0xf]  ;;  %v2450_v42 = vld [vmem:[%s4185_s1 + $0x330] sm:$0xf0] }
  0x28   :  { %1152 = vmatpush.bf16.msrb.mxu0 %v2277_v57  ;;  %1106 = vmatpush.bf16.msrb.mxu3 %v2101_v28  ;;  %v3191_v40 = vor.u32 %v2539_v36, %v1978_v37  ;;  %v2453_v43 = vor.u32 %v2658_v41, %v2450_v42  ;;  %v2602_v44 = vld [vmem:[%s4185_s1 + $0x164] sm:$0xf]  ;;  %v2226_v45 = vld [vmem:[%s4185_s1 + $0x170] sm:$0xf0]  ;;  %v1968_v57 = vld [vmem:[%s4186_s0 + $0x60] sm:$0xf] }
  0x29   :  { %1201 = vmatpush.bf16.msrb.mxu1 %v2405_v58  ;;  %v2634_v47 = vld [vmem:[%s4185_s1 + $0x264] sm:$0xf]  ;;  %v2229_v48 = vor.u32 %v2602_v44, %v2226_v45  ;;  %v2354_v49 = vld [vmem:[%s4185_s1 + $0x270] sm:$0xf0]  ;;  %v2540_v58 = vld [vmem:[%s4186_s0 + $0x6c] sm:$0xf0] }
  0x2a   :  { %1254 = vmatpush.bf16.msrb.mxu2 %v2469_v61  ;;  %v2566_v50 = vld [vmem:[%s4185_s1 + $0x44] sm:$0xf]  ;;  %v2082_v53 = vld [vmem:[%s4185_s1 + $0x50] sm:$0xf0]  ;;  %v2357_v54 = vor.u32 %v2634_v47, %v2354_v49  ;;  %v1976_v61 = vld [vmem:[%s4186_s0 + $0x68] sm:$0xf]  ;;  %v3240_v63 = vor.u32 %v2540_v58, %v1968_v57 }
  0x2b   :  { %v2085_v55 = vor.u32 %v2566_v50, %v2082_v53  ;;  %v2538_v59 = vld [vmem:[%s4186_s0 + $0x64] sm:$0xf]  ;;  %v1970_v60 = vld [vmem:[%s4186_s0 + $0x70] sm:$0xf0]  ;;  %v2541_v62 = vld [vmem:[%s4186_s0 + $0x74] sm:$0xf0] }
  0x2c   :  { %1153 = vmatpush.bf16.msrb.mxu0 %v2261_v2  ;;  %v2543_v1 = vld [vmem:[%s4186_s0 + $0x8c] sm:$0xf]  ;;  %v1994_v2 = vld [vmem:[%s4186_s0 + $0x98] sm:$0xf0]  ;;  %v3248_v3 = vor.u32 %v2538_v59, %v1970_v60  ;;  %v3250_v4 = vor.u32 %v2541_v62, %v1976_v61  ;;  %v2210_v7 = vld [vmem:[%s4185_s1 + $0x150] sm:$0xf0] }
  0x2d   :  { %1202 = vmatpush.bf16.msrb.mxu1 %v2389_v6  ;;  %1107 = vmatpush.bf16.msrb.mxu3 %v2085_v55  ;;  %v3252_v5 = vor.u32 %v2543_v1, %v1994_v2  ;;  %v2598_v6 = vld [vmem:[%s4185_s1 + $0x144] sm:$0xf]  ;;  %v2338_v10 = vld [vmem:[%s4185_s1 + $0x250] sm:$0xf0]  ;;  %v1984_v16 = vld [vmem:[%s4186_s0 + $0x80] sm:$0xf] }
  0x2e   :  { %1255 = vmatpush.bf16.msrb.mxu2 %v2453_v43  ;;  %v2630_v8 = vld [vmem:[%s4185_s1 + $0x244] sm:$0xf]  ;;  %v2213_v9 = vor.u32 %v2598_v6, %v2210_v7  ;;  %v2066_v12 = vld [vmem:[%s4185_s1 + $0x30] sm:$0xf0]  ;;  %v2544_v20 = vld [vmem:[%s4186_s0 + $0x8c] sm:$0xf0] }
  0x2f   :  { %v2562_v11 = vld [vmem:[%s4185_s1 + $0x24] sm:$0xf]  ;;  %v2341_v13 = vor.u32 %v2630_v8, %v2338_v10  ;;  %v1986_v22 = vld [vmem:[%s4186_s0 + $0x90] sm:$0xf0]  ;;  %v2545_v24 = vld [vmem:[%s4186_s0 + $0x94] sm:$0xf0]  ;;  %v3295_v25 = vor.u32 %v2544_v20, %v1984_v16 }
  0x30   :  { %1154 = vmatpush.bf16.msrb.mxu0 %v2245_v23  ;;  %v2069_v15 = vor.u32 %v2562_v11, %v2066_v12  ;;  %v2542_v21 = vld [vmem:[%s4186_s0 + $0x84] sm:$0xf]  ;;  %v1992_v23 = vld [vmem:[%s4186_s0 + $0x88] sm:$0xf]  ;;  %v2547_v26 = vld [vmem:[%s4186_s0 + $0xac] sm:$0xf] }
  0x31   :  { %1203 = vmatpush.bf16.msrb.mxu1 %v2373_v27  ;;  %v2010_v27 = vld [vmem:[%s4186_s0 + $0xb8] sm:$0xf0]  ;;  %v3303_v28 = vor.u32 %v2542_v21, %v1986_v22  ;;  %v3305_v29 = vor.u32 %v2545_v24, %v1992_v23  ;;  %v2654_v31 = vld [vmem:[%s4185_s1 + $0x304] sm:$0xf]  ;;  %v2434_v32 = vld [vmem:[%s4185_s1 + $0x310] sm:$0xf0] }
  0x32   :  { %1108 = vmatpush.bf16.msrb.mxu3 %v2069_v15  ;;  %v3307_v30 = vor.u32 %v2547_v26, %v2010_v27  ;;  %v2437_v33 = vor.u32 %v2654_v31, %v2434_v32  ;;  %v2594_v34 = vld [vmem:[%s4185_s1 + $0x124] sm:$0xf]  ;;  %v2194_v36 = vld [vmem:[%s4185_s1 + $0x130] sm:$0xf0]  ;;  %v2548_v49 = vld [vmem:[%s4186_s0 + $0xac] sm:$0xf0] }
  0x33   :  { %919 = vmatmul.bf16.gmra.mxu0 %v3124_v14  ;;  %v2626_v37 = vld [vmem:[%s4185_s1 + $0x224] sm:$0xf]  ;;  %v2197_v41 = vor.u32 %v2594_v34, %v2194_v36  ;;  %v2322_v42 = vld [vmem:[%s4185_s1 + $0x230] sm:$0xf0]  ;;  %v2549_v55 = vld [vmem:[%s4186_s0 + $0xb4] sm:$0xf0] }
  0x34   :  { %968 = vmatmul.bf16.gmra.mxu1 %v3132_v17  ;;  %1155 = vmatpush.bf16.msrb.mxu0 %v2229_v48  ;;  %v2558_v43 = vld [vmem:[%s4185_s1 + $0x4] sm:$0xf]  ;;  %v2050_v44 = vld [vmem:[%s4185_s1 + $0x10] sm:$0xf0]  ;;  %v2325_v45 = vor.u32 %v2626_v37, %v2322_v42  ;;  %v2000_v48 = vld [vmem:[%s4186_s0 + $0xa0] sm:$0xf] }
  0x35   :  { %1017 = vmatmul.bf16.gmra.mxu2 %v3134_v18  ;;  %1204 = vmatpush.bf16.msrb.mxu1 %v2357_v54  ;;  %v2053_v47 = vor.u32 %v2558_v43, %v2050_v44  ;;  %v2546_v50 = vld [vmem:[%s4186_s0 + $0xa4] sm:$0xf]  ;;  %v2002_v53 = vld [vmem:[%s4186_s0 + $0xb0] sm:$0xf0]  ;;  %v2008_v54 = vld [vmem:[%s4186_s0 + $0xa8] sm:$0xf]  ;;  %v3356_v57 = vor.u32 %v2548_v49, %v2000_v48 }
  0x36   :  { %2496 = vmatmul.msk.bf16.gmra.mxu3 %vm881_vm0, %v3136_v19  ;;  %1256 = vmatpush.bf16.msrb.mxu2 %v2437_v33  ;;  %v2551_v58 = vld [vmem:[%s4186_s0 + $0xcc] sm:$0xf]  ;;  %v2026_v59 = vld [vmem:[%s4186_s0 + $0xd8] sm:$0xf0]  ;;  %v3364_v60 = vor.u32 %v2546_v50, %v2002_v53  ;;  %v3366_v61 = vor.u32 %v2549_v55, %v2008_v54  ;;  %v2590_v1 = vld [vmem:[%s4185_s1 + $0x104] sm:$0xf] }
  0x37   :  { %1109 = vmatpush.bf16.msrb.mxu3 %v2053_v47  ;;  %v3368_v62 = vor.u32 %v2551_v58, %v2026_v59  ;;  %v2178_v2 = vld [vmem:[%s4185_s1 + $0x110] sm:$0xf0]  ;;  %v2622_v6 = vld [vmem:[%s4185_s1 + $0x204] sm:$0xf]  ;;  %v2168_v10 = vld [vmem:[%s4185_s1 + $0xe8] sm:$0xf] }
  0x38   :  { %1156 = vmatpush.bf16.msrb.mxu0 %v2213_v9  ;;  %v2181_v7 = vor.u32 %v2590_v1, %v2178_v2  ;;  %v2306_v8 = vld [vmem:[%s4185_s1 + $0x210] sm:$0xf0]  ;;  %v2589_v11 = vld [vmem:[%s4185_s1 + $0xf4] sm:$0xf0]  ;;  %v2552_v15 = vld [vmem:[%s4186_s0 + $0xcc] sm:$0xf0] }
  0x39   :  { %1205 = vmatpush.bf16.msrb.mxu1 %v2341_v13  ;;  %v2309_v9 = vor.u32 %v2622_v6, %v2306_v8  ;;  %v2169_v12 = vor.u32 %v2589_v11, %v2168_v10  ;;  %v2016_v13 = vld [vmem:[%s4186_s0 + $0xc0] sm:$0xf]  ;;  %v2550_v16 = vld [vmem:[%s4186_s0 + $0xc4] sm:$0xf]  ;;  %v2018_v20 = vld [vmem:[%s4186_s0 + $0xd0] sm:$0xf0] }
  0x3a   :  { %v2024_v21 = vld [vmem:[%s4186_s0 + $0xc8] sm:$0xf]  ;;  %v2553_v22 = vld [vmem:[%s4186_s0 + $0xd4] sm:$0xf0]  ;;  %v3411_v23 = vor.u32 %v2552_v15, %v2016_v13  ;;  %v2555_v24 = vld [vmem:[%s4186_s0 + $0xec] sm:$0xf]  ;;  %v3419_v27 = vor.u32 %v2550_v16, %v2018_v20 }
  0x3b   :  { %1298 = vmatpush.bf16.msra.mxu3 %v2169_v12  ;;  %v2042_v26 = vld [vmem:[%s4186_s0 + $0xf8] sm:$0xf0]  ;;  %v3421_v31 = vor.u32 %v2553_v22, %v2024_v21  ;;  %v2488_v33 = vld [vmem:[%s4185_s1 + $0x368] sm:$0xf]  ;;  %v2669_v34 = vld [vmem:[%s4185_s1 + $0x374] sm:$0xf0] }
  0x3c   :  { %1157 = vmatpush.bf16.msrb.mxu0 %v2197_v41  ;;  %v3423_v32 = vor.u32 %v2555_v24, %v2042_v26  ;;  %v2489_v36 = vor.u32 %v2669_v34, %v2488_v33  ;;  %v2296_v37 = vld [vmem:[%s4185_s1 + $0x1e8] sm:$0xf]  ;;  %v2621_v41 = vld [vmem:[%s4185_s1 + $0x1f4] sm:$0xf0]  ;;  %v2032_v43 = vld [vmem:[%s4186_s0 + $0xe0] sm:$0xf] }
  0x3d   :  { %1206 = vmatpush.bf16.msrb.mxu1 %v2325_v45  ;;  %v2297_v42 = vor.u32 %v2621_v41, %v2296_v37  ;;  %v2556_v44 = vld [vmem:[%s4186_s0 + $0xec] sm:$0xf0]  ;;  %v2554_v45 = vld [vmem:[%s4186_s0 + $0xe4] sm:$0xf]  ;;  %v2034_v47 = vld [vmem:[%s4186_s0 + $0xf0] sm:$0xf0] }
  0x3e   :  { %1449 = vmatpush.bf16.msra.mxu2 %v2489_v36  ;;  %v2424_v48 = vld [vmem:[%s4185_s1 + $0x2e8] sm:$0xf]  ;;  %v2653_v49 = vld [vmem:[%s4185_s1 + $0x2f4] sm:$0xf0]  ;;  %v3472_v1 = vor.u32 %v2556_v44, %v2032_v43  ;;  %v3474_v2 = vor.u32 %v2554_v45, %v2034_v47  ;;  %v3491_v11 = vld [vmem:[%s4187_s2] sm:$0xf] }
  0x3f   :  { %v2152_v50 = vld [vmem:[%s4185_s1 + $0xc8] sm:$0xf]  ;;  %v2557_v54 = vld [vmem:[%s4186_s0 + $0xf4] sm:$0xf0]  ;;  %v2425_v55 = vor.u32 %v2653_v49, %v2424_v48  ;;  %v3503_v16 = vperm.slane %v3491_v11, 0 }
  0x40   :  { %1158 = vmatpush.bf16.msrb.mxu0 %v2181_v7  ;;  %v2040_v53 = vld [vmem:[%s4186_s0 + $0xe8] sm:$0xf]  ;;  %v2585_v58 = vld [vmem:[%s4185_s1 + $0xd4] sm:$0xf0] }
  0x41   :  { %1207 = vmatpush.bf16.msrb.mxu1 %v2309_v9  ;;  %v2153_v59 = vor.u32 %v2585_v58, %v2152_v50  ;;  %v3476_v6 = vor.u32 %v2557_v54, %v2040_v53  ;;  %v2280_v7 = vld [vmem:[%s4185_s1 + $0x1c8] sm:$0xf]  ;;  %v2617_v8 = vld [vmem:[%s4185_s1 + $0x1d4] sm:$0xf0] }
  0x42   :  { %v2281_v9 = vor.u32 %v2617_v8, %v2280_v7  ;;  %v2408_v12 = vld [vmem:[%s4185_s1 + $0x2c8] sm:$0xf]  ;;  %v2649_v13 = vld [vmem:[%s4185_s1 + $0x2d4] sm:$0xf0] }
  0x43   :  { %924 = vmatmul.bf16.gmra.mxu0 %v3179_v35  ;;  %1299 = vmatpush.bf16.msra.mxu3 %v2153_v59  ;;  %v2136_v15 = vld [vmem:[%s4185_s1 + $0xa8] sm:$0xf]  ;;  %v2409_v20 = vor.u32 %v2649_v13, %v2408_v12  ;;  %v2581_v21 = vld [vmem:[%s4185_s1 + $0xb4] sm:$0xf0] }
  0x44   :  { %973 = vmatmul.bf16.gmra.mxu1 %v3187_v38  ;;  %1347 = vmatpush.bf16.msra.mxu0 %v2297_v42  ;;  %v2137_v22 = vor.u32 %v2581_v21, %v2136_v15  ;;  %v2472_v37 = vld [vmem:[%s4185_s1 + $0x348] sm:$0xf]  ;;  %v2665_v41 = vld [vmem:[%s4185_s1 + $0x354] sm:$0xf0] }
  0x45   :  { %1022 = vmatmul.bf16.gmra.mxu2 %v3189_v39  ;;  %1396 = vmatpush.bf16.msra.mxu1 %v2425_v55  ;;  %v2473_v42 = vor.u32 %v2665_v41, %v2472_v37  ;;  %v2264_v43 = vld [vmem:[%s4185_s1 + $0x1a8] sm:$0xf]  ;;  %v2613_v44 = vld [vmem:[%s4185_s1 + $0x1b4] sm:$0xf0] }
  0x46   :  { %2497 = vmatmul.msk.bf16.gmra.mxu3 %vm881_vm0, %v3191_v40  ;;  %v2265_v47 = vor.u32 %v2613_v44, %v2264_v43  ;;  %v2392_v59 = vld [vmem:[%s4185_s1 + $0x2a8] sm:$0xf]  ;;  %v2645_v7 = vld [vmem:[%s4185_s1 + $0x2b4] sm:$0xf0] }
  0x47   :  { %1300 = vmatpush.bf16.msra.mxu3 %v2137_v22  ;;  %1450 = vmatpush.bf16.msra.mxu2 %v2473_v42  ;;  %v2120_v8 = vld [vmem:[%s4185_s1 + $0x88] sm:$0xf]  ;;  %v2577_v12 = vld [vmem:[%s4185_s1 + $0x94] sm:$0xf0] }
  0x48   :  { %1348 = vmatpush.bf16.msra.mxu0 %v2281_v9  ;;  %v2393_v9 = vor.u32 %v2645_v7, %v2392_v59  ;;  %v2609_v37 = vld [vmem:[%s4185_s1 + $0x194] sm:$0xf0] }
  0x49   :  { %1397 = vmatpush.bf16.msra.mxu1 %v2409_v20  ;;  %v2573_v7 = vld [vmem:[%s4185_s1 + $0x74] sm:$0xf0] }
  0x4c   :  { %1349 = vmatpush.bf16.msra.mxu0 %v2265_v47 }
  0x4d   :  { %1398 = vmatpush.bf16.msra.mxu1 %v2393_v9 }
  0x53   :  { %929 = vmatmul.bf16.gmra.mxu0 %v3240_v63 }
  0x54   :  { %978 = vmatmul.bf16.gmra.mxu1 %v3248_v3 }
  0x55   :  { %1027 = vmatmul.bf16.gmra.mxu2 %v3250_v4 }
  0x56   :  { %2498 = vmatmul.msk.bf16.gmra.mxu3 %vm881_vm0, %v3252_v5 }
  0x63   :  { %934 = vmatmul.bf16.gmra.mxu0 %v3295_v25 }
  0x64   :  { %983 = vmatmul.bf16.gmra.mxu1 %v3303_v28 }
  0x65   :  { %1032 = vmatmul.bf16.gmra.mxu2 %v3305_v29 }
  0x66   :  { %2499 = vmatmul.msk.bf16.gmra.mxu3 %vm881_vm0, %v3307_v30 }
  0x73   :  { %939 = vmatmul.bf16.gmra.mxu0 %v3356_v57 }
  0x74   :  { %988 = vmatmul.bf16.gmra.mxu1 %v3364_v60 }
  0x75   :  { %1037 = vmatmul.bf16.gmra.mxu2 %v3366_v61 }
  0x76   :  { %2500 = vmatmul.msk.bf16.gmra.mxu3 %vm881_vm0, %v3368_v62 }
  0x83   :  { %944 = vmatmul.bf16.gmra.mxu0 %v3411_v23 }
  0x84   :  { %993 = vmatmul.bf16.gmra.mxu1 %v3419_v27 }
  0x85   :  { %1042 = vmatmul.bf16.gmra.mxu2 %v3421_v31 }
  0x86   :  { %2501 = vmatmul.msk.bf16.gmra.mxu3 %vm881_vm0, %v3423_v32 }
  0x93   :  { %949 = vmatmul.bf16.gmra.mxu0 %v3472_v1 }
  0x94   :  { %998 = vmatmul.bf16.gmra.mxu1 %v3474_v2 }
  0x95   :  { %1047 = vmatmul.bf16.gmra.mxu2 %v3476_v6 }
  0x96   :  { %1110 = vmatmul.bf16.vlgmr.msrb.gmra.mxu3 %v3054_v46 }
  0x99   :  { %v1062_v10 = vpop.f32.mrf.mxu3 }
  0xa0   :  { %v915_v24 = vpop.f32.mrf.mxu0 }
  0xa1   :  { %v916_v26 = vadd.f32 %v915_v24, %v3503_v16  ;;  %v964_v33 = vpop.f32.mrf.mxu1  ;;  %v1064_v34 = vpop.f32.mrf.mxu3 }
  0xa3   :  { %v965_v36 = vadd.f32 %v964_v33, %v916_v26  ;;  %1159 = vmatmul.bf16.vlgmr.msrb.gmra.mxu0 %v3065_v51 }
  0xa4   :  { %1208 = vmatmul.bf16.vlgmr.msrb.gmra.mxu1 %v3067_v52 }
  0xa5   :  { %2502 = vmatmul.msk.bf16.vlgmr.msrb.gmra.mxu2 %vm881_vm0, %v2954_v0 }
  0xa6   :  { %1115 = vmatmul.bf16.gmra.mxu3 %v3124_v14 }
  0xa8   :  { %v1013_v45 = vpop.f32.mrf.mxu2  ;;  %v917_v49 = vpop.f32.mrf.mxu0 }
  0xa9   :  { %v1014_v48 = vadd.f32 %v1013_v45, %v965_v36  ;;  %v918_v50 = vadd.f32 %v917_v49, %v3503_v16  ;;  %v966_v53 = vpop.f32.mrf.mxu1  ;;  %v1067_v54 = vpop.f32.mrf.mxu3  ;;  %v2248_v36 = vld [vmem:[%s4185_s1 + $0x188] sm:$0xf] }
  0xaa   :  { %v2249_v41 = vor.u32 %v2609_v37, %v2248_v36  ;;  %v2605_v37 = vld [vmem:[%s4185_s1 + $0x174] sm:$0xf0] }
  0xab   :  { %v3527_v55 = vadd.f32 %v1062_v10, %v1014_v48  ;;  %v967_v58 = vadd.f32 %v966_v53, %v918_v50  ;;  %v2121_v10 = vor.u32 %v2577_v12, %v2120_v8  ;;  %v2376_v50 = vld [vmem:[%s4185_s1 + $0x288] sm:$0xf]  ;;  %v2641_v53 = vld [vmem:[%s4185_s1 + $0x294] sm:$0xf0] }
  0xac   :  { %1350 = vmatpush.bf16.msra.mxu0 %v2249_v41  ;;  %v2377_v59 = vor.u32 %v2641_v53, %v2376_v50 }
  0xad   :  { %1301 = vmatpush.bf16.msra.mxu3 %v2121_v10 }
  0xae   :  { %1399 = vmatpush.bf16.msra.mxu1 %v2377_v59  ;;  %v2637_v59 = vld [vmem:[%s4185_s1 + $0x274] sm:$0xf0] }
  0xb0   :  { %v1015_v13 = vpop.f32.mrf.mxu2  ;;  %v920_v20 = vpop.f32.mrf.mxu0 }
  0xb1   :  { %v1016_v15 = vadd.f32 %v1015_v13, %v967_v58  ;;  %v921_v21 = vadd.f32 %v920_v20, %v3503_v16  ;;  %v969_v22 = vpop.f32.mrf.mxu1  ;;  %v1069_v24 = vpop.f32.mrf.mxu3  ;;  %v2104_v58 = vld [vmem:[%s4185_s1 + $0x68] sm:$0xf] }
  0xb3   :  { %v3542_v26 = vadd.f32 %v1064_v34, %v1016_v15  ;;  %v970_v33 = vadd.f32 %v969_v22, %v921_v21  ;;  %1164 = vmatmul.bf16.gmra.mxu0 %v3132_v17  ;;  %v2456_v22 = vld [vmem:[%s4185_s1 + $0x328] sm:$0xf] }
  0xb4   :  { %1213 = vmatmul.bf16.gmra.mxu1 %v3134_v18 }
  0xb5   :  { %2503 = vmatmul.msk.bf16.gmra.mxu2 %vm881_vm0, %v3075_v56 }
  0xb6   :  { %1120 = vmatmul.bf16.gmra.mxu3 %v3179_v35 }
  0xb8   :  { %v1018_v34 = vpop.f32.mrf.mxu2  ;;  %v922_v43 = vpop.f32.mrf.mxu0 }
  0xb9   :  { %v1019_v42 = vadd.f32 %v1018_v34, %v970_v33  ;;  %v923_v44 = vadd.f32 %v922_v43, %v3503_v16  ;;  %v971_v45 = vpop.f32.mrf.mxu1  ;;  %v1072_v47 = vpop.f32.mrf.mxu3  ;;  %v2661_v33 = vld [vmem:[%s4185_s1 + $0x334] sm:$0xf0] }
  0xba   :  { %v2457_v36 = vor.u32 %v2661_v33, %v2456_v22 }
  0xbb   :  { %v3556_v48 = vadd.f32 %v1067_v54, %v1019_v42  ;;  %v972_v49 = vadd.f32 %v971_v45, %v923_v44  ;;  %v2105_v54 = vor.u32 %v2573_v7, %v2104_v58  ;;  %v2360_v58 = vld [vmem:[%s4185_s1 + $0x268] sm:$0xf] }
  0xbc   :  { %1451 = vmatpush.bf16.msra.mxu2 %v2457_v36  ;;  %v2088_v7 = vld [vmem:[%s4185_s1 + $0x48] sm:$0xf] }
  0xbd   :  { %1302 = vmatpush.bf16.msra.mxu3 %v2105_v54  ;;  %v2361_v54 = vor.u32 %v2637_v59, %v2360_v58  ;;  %v2344_v59 = vld [vmem:[%s4185_s1 + $0x248] sm:$0xf] }
  0xbf   :  { %1400 = vmatpush.bf16.msra.mxu1 %v2361_v54  ;;  %v2072_v54 = vld [vmem:[%s4185_s1 + $0x28] sm:$0xf] }
  0xc0   :  { %v1020_v8 = vpop.f32.mrf.mxu2  ;;  %v925_v12 = vpop.f32.mrf.mxu0 }
  0xc1   :  { %v1021_v9 = vadd.f32 %v1020_v8, %v972_v49  ;;  %v926_v10 = vadd.f32 %v925_v12, %v3503_v16  ;;  %v974_v13 = vpop.f32.mrf.mxu1  ;;  %v1074_v15 = vpop.f32.mrf.mxu3  ;;  %v2569_v8 = vld [vmem:[%s4185_s1 + $0x54] sm:$0xf0] }
  0xc3   :  { %v3571_v20 = vadd.f32 %v1069_v24, %v1021_v9  ;;  %v975_v21 = vadd.f32 %v974_v13, %v926_v10  ;;  %1169 = vmatmul.bf16.gmra.mxu0 %v3187_v38  ;;  %v2232_v24 = vld [vmem:[%s4185_s1 + $0x168] sm:$0xf] }
  0xc4   :  { %1218 = vmatmul.bf16.gmra.mxu1 %v3189_v39  ;;  %v2233_v41 = vor.u32 %v2605_v37, %v2232_v24  ;;  %v2216_v24 = vld [vmem:[%s4185_s1 + $0x148] sm:$0xf]  ;;  %v2601_v37 = vld [vmem:[%s4185_s1 + $0x154] sm:$0xf0] }
  0xc5   :  { %2504 = vmatmul.msk.bf16.gmra.mxu2 %vm881_vm0, %v3136_v19 }
  0xc6   :  { %1125 = vmatmul.bf16.gmra.mxu3 %v3240_v63  ;;  %1351 = vmatpush.bf16.msra.mxu0 %v2233_v41 }
  0xc8   :  { %v1023_v34 = vpop.f32.mrf.mxu2  ;;  %v927_v43 = vpop.f32.mrf.mxu0 }
  0xc9   :  { %v1024_v42 = vadd.f32 %v1023_v34, %v975_v21  ;;  %v928_v44 = vadd.f32 %v927_v43, %v3503_v16  ;;  %v976_v45 = vpop.f32.mrf.mxu1  ;;  %v1077_v49 = vpop.f32.mrf.mxu3  ;;  %v2217_v34 = vor.u32 %v2601_v37, %v2216_v24 }
  0xcb   :  { %v3591_v50 = vadd.f32 %v1072_v47, %v1024_v42  ;;  %v977_v53 = vadd.f32 %v976_v45, %v928_v44  ;;  %v2089_v47 = vor.u32 %v2569_v8, %v2088_v7  ;;  %1352 = vmatpush.bf16.msra.mxu0 %v2217_v34  ;;  %v2633_v7 = vld [vmem:[%s4185_s1 + $0x254] sm:$0xf0] }
  0xcc   :  { %v2345_v8 = vor.u32 %v2633_v7, %v2344_v59  ;;  %v2657_v34 = vld [vmem:[%s4185_s1 + $0x314] sm:$0xf0] }
  0xcd   :  { %1303 = vmatpush.bf16.msra.mxu3 %v2089_v47  ;;  %v2565_v47 = vld [vmem:[%s4185_s1 + $0x34] sm:$0xf0] }
  0xce   :  { %1401 = vmatpush.bf16.msra.mxu1 %v2345_v8 }
  0xd0   :  { %v1025_v9 = vpop.f32.mrf.mxu2  ;;  %v930_v10 = vpop.f32.mrf.mxu0 }
  0xd1   :  { %v1026_v12 = vadd.f32 %v1025_v9, %v977_v53  ;;  %v931_v13 = vadd.f32 %v930_v10, %v3503_v16  ;;  %v979_v21 = vpop.f32.mrf.mxu1  ;;  %v1079_v22 = vpop.f32.mrf.mxu3 }
  0xd3   :  { %v3606_v33 = vadd.f32 %v1074_v15, %v1026_v12  ;;  %v980_v36 = vadd.f32 %v979_v21, %v931_v13  ;;  %1174 = vmatmul.bf16.gmra.mxu0 %v3248_v3 }
  0xd4   :  { %1223 = vmatmul.bf16.gmra.mxu1 %v3250_v4 }
  0xd5   :  { %2505 = vmatmul.msk.bf16.gmra.mxu2 %vm881_vm0, %v3191_v40 }
  0xd6   :  { %1130 = vmatmul.bf16.gmra.mxu3 %v3295_v25 }
  0xd8   :  { %v1028_v15 = vpop.f32.mrf.mxu2  ;;  %v932_v42 = vpop.f32.mrf.mxu0 }
  0xd9   :  { %v1029_v41 = vadd.f32 %v1028_v15, %v980_v36  ;;  %v933_v43 = vadd.f32 %v932_v42, %v3503_v16  ;;  %v981_v44 = vpop.f32.mrf.mxu1  ;;  %v1082_v45 = vpop.f32.mrf.mxu3  ;;  %v2440_v15 = vld [vmem:[%s4185_s1 + $0x308] sm:$0xf]  ;;  %v2597_v42 = vld [vmem:[%s4185_s1 + $0x134] sm:$0xf0] }
  0xdb   :  { %v3620_v53 = vadd.f32 %v1077_v49, %v1029_v41  ;;  %v982_v58 = vadd.f32 %v981_v44, %v933_v43  ;;  %v2073_v49 = vor.u32 %v2565_v47, %v2072_v54  ;;  %v2441_v41 = vor.u32 %v2657_v34, %v2440_v15 }
  0xdd   :  { %1304 = vmatpush.bf16.msra.mxu3 %v2073_v49  ;;  %1452 = vmatpush.bf16.msra.mxu2 %v2441_v41 }
  0xe0   :  { %v1030_v9 = vpop.f32.mrf.mxu2  ;;  %v935_v10 = vpop.f32.mrf.mxu0 }
  0xe1   :  { %v1031_v12 = vadd.f32 %v1030_v9, %v982_v58  ;;  %v936_v13 = vadd.f32 %v935_v10, %v3503_v16  ;;  %v984_v21 = vpop.f32.mrf.mxu1  ;;  %v1084_v36 = vpop.f32.mrf.mxu3  ;;  %v2328_v9 = vld [vmem:[%s4185_s1 + $0x228] sm:$0xf] }
  0xe2   :  { %v2056_v10 = vld [vmem:[%s4185_s1 + $0x8] sm:$0xf] }
  0xe3   :  { %v3635_v24 = vadd.f32 %v1079_v22, %v1031_v12  ;;  %v985_v37 = vadd.f32 %v984_v21, %v936_v13  ;;  %1179 = vmatmul.bf16.gmra.mxu0 %v3303_v28  ;;  %v2200_v22 = vld [vmem:[%s4185_s1 + $0x128] sm:$0xf]  ;;  %v2629_v12 = vld [vmem:[%s4185_s1 + $0x234] sm:$0xf0] }
  0xe4   :  { %1228 = vmatmul.bf16.gmra.mxu1 %v3305_v29  ;;  %v2201_v44 = vor.u32 %v2597_v42, %v2200_v22  ;;  %v2329_v13 = vor.u32 %v2629_v12, %v2328_v9  ;;  %v2561_v21 = vld [vmem:[%s4185_s1 + $0x14] sm:$0xf0] }
  0xe5   :  { %2506 = vmatmul.msk.bf16.gmra.mxu2 %vm881_vm0, %v3252_v5 }
  0xe6   :  { %1135 = vmatmul.bf16.gmra.mxu3 %v3356_v57  ;;  %1353 = vmatpush.bf16.msra.mxu0 %v2201_v44 }
  0xe7   :  { %1402 = vmatpush.bf16.msra.mxu1 %v2329_v13 }
  0xe8   :  { %v1033_v43 = vpop.f32.mrf.mxu2  ;;  %v937_v59 = vpop.f32.mrf.mxu0 }
  0xe9   :  { %v1034_v58 = vadd.f32 %v1033_v43, %v985_v37  ;;  %v938_v7 = vadd.f32 %v937_v59, %v3503_v16  ;;  %v986_v54 = vpop.f32.mrf.mxu1  ;;  %v1087_v8 = vpop.f32.mrf.mxu3  ;;  %v2593_v59 = vld [vmem:[%s4185_s1 + $0x114] sm:$0xf0] }
  0xeb   :  { %v3655_v47 = vadd.f32 %v1082_v45, %v1034_v58  ;;  %v987_v49 = vadd.f32 %v986_v54, %v938_v7  ;;  %v2057_v45 = vor.u32 %v2561_v21, %v2056_v10  ;;  %v2184_v58 = vld [vmem:[%s4185_s1 + $0x108] sm:$0xf] }
  0xec   :  { %v2185_v7 = vor.u32 %v2593_v59, %v2184_v58 }
  0xed   :  { %1305 = vmatpush.bf16.msra.mxu3 %v2057_v45  ;;  %v2312_v45 = vld [vmem:[%s4185_s1 + $0x208] sm:$0xf] }
  0xee   :  { %1354 = vmatpush.bf16.msra.mxu0 %v2185_v7 }
  0xf0   :  { %v1035_v37 = vpop.f32.mrf.mxu2  ;;  %v940_v34 = vpop.f32.mrf.mxu0 }
  0xf1   :  { %v1036_v15 = vadd.f32 %v1035_v37, %v987_v49  ;;  %v941_v41 = vadd.f32 %v940_v34, %v3503_v16  ;;  %v989_v22 = vpop.f32.mrf.mxu1  ;;  %v1089_v42 = vpop.f32.mrf.mxu3  ;;  %v2625_v37 = vld [vmem:[%s4185_s1 + $0x214] sm:$0xf0]  ;;  %v2587_v34 = vld [vmem:[%s4185_s1 + $0xec] sm:$0xf] }
  0xf3   :  { %v3670_v43 = vadd.f32 %v1084_v36, %v1036_v15  ;;  %v990_v44 = vadd.f32 %v989_v22, %v941_v41  ;;  %1184 = vmatmul.bf16.gmra.mxu0 %v3364_v60  ;;  %v2313_v15 = vor.u32 %v2625_v37, %v2312_v45  ;;  %v2170_v41 = vld [vmem:[%s4185_s1 + $0xf8] sm:$0xf0] }
  0xf4   :  { %1233 = vmatmul.bf16.gmra.mxu1 %v3366_v61  ;;  %v2298_v45 = vld [vmem:[%s4185_s1 + $0x1f8] sm:$0xf0] }
  0xf5   :  { %2507 = vmatmul.msk.bf16.gmra.mxu2 %vm881_vm0, %v3307_v30  ;;  %1403 = vmatpush.bf16.msra.mxu1 %v2313_v15 }
  0xf6   :  { %1140 = vmatmul.bf16.gmra.mxu3 %v3411_v23 }
  0xf8   :  { %v1038_v36 = vpop.f32.mrf.mxu2  ;;  %v942_v49 = vpop.f32.mrf.mxu0 }
  0xf9   :  { %v1039_v54 = vadd.f32 %v1038_v36, %v990_v44  ;;  %v943_v9 = vadd.f32 %v942_v49, %v3503_v16  ;;  %v991_v12 = vpop.f32.mrf.mxu1  ;;  %v1092_v10 = vpop.f32.mrf.mxu3 }
  0xfb   :  { %v3684_v13 = vadd.f32 %v1087_v8, %v1039_v54  ;;  %v992_v21 = vadd.f32 %v991_v12, %v943_v9  ;;  %v2173_v8 = vor.u32 %v2587_v34, %v2170_v41  ;;  %v2667_v9 = vld [vmem:[%s4185_s1 + $0x36c] sm:$0xf]  ;;  %v2490_v12 = vld [vmem:[%s4185_s1 + $0x378] sm:$0xf0] }
  0xfd   :  { %1494 = vmatpush.bf16.msrb.mxu3 %v2173_v8 }
 0x100   :  { %v1040_v22 = vpop.f32.mrf.mxu2  ;;  %v945_v58 = vpop.f32.mrf.mxu0 }
 0x101   :  { %v1041_v44 = vadd.f32 %v1040_v22, %v992_v21  ;;  %v946_v59 = vadd.f32 %v945_v58, %v3503_v16  ;;  %v994_v36 = vpop.f32.mrf.mxu1  ;;  %v1094_v7 = vpop.f32.mrf.mxu3  ;;  %v2493_v21 = vor.u32 %v2667_v9, %v2490_v12 }
 0x103   :  { %v3699_v54 = vadd.f32 %v1089_v42, %v1041_v44  ;;  %v995_v49 = vadd.f32 %v994_v36, %v946_v59  ;;  %1189 = vmatmul.bf16.gmra.mxu0 %v3419_v27  ;;  %v2619_v42 = vld [vmem:[%s4185_s1 + $0x1ec] sm:$0xf]  ;;  %1645 = vmatpush.bf16.msrb.mxu2 %v2493_v21  ;;  %v2426_v36 = vld [vmem:[%s4185_s1 + $0x2f8] sm:$0xf0] }
 0x104   :  { %1238 = vmatmul.bf16.gmra.mxu1 %v3421_v31  ;;  %v2301_v15 = vor.u32 %v2619_v42, %v2298_v45  ;;  %v2651_v59 = vld [vmem:[%s4185_s1 + $0x2ec] sm:$0xf]  ;;  %v2154_v21 = vld [vmem:[%s4185_s1 + $0xd8] sm:$0xf0] }
 0x105   :  { %2508 = vmatmul.msk.bf16.gmra.mxu2 %vm881_vm0, %v3368_v62  ;;  %v2429_v12 = vor.u32 %v2651_v59, %v2426_v36  ;;  %v2615_v59 = vld [vmem:[%s4185_s1 + $0x1cc] sm:$0xf]  ;;  %v2282_v36 = vld [vmem:[%s4185_s1 + $0x1d8] sm:$0xf0] }
 0x106   :  { %1145 = vmatmul.bf16.gmra.mxu3 %v3472_v1  ;;  %1543 = vmatpush.bf16.msrb.mxu0 %v2301_v15 }
 0x107   :  { %1592 = vmatpush.bf16.msrb.mxu1 %v2429_v12 }
 0x108   :  { %v1043_v37 = vpop.f32.mrf.mxu2  ;;  %v947_v41 = vpop.f32.mrf.mxu0 }
 0x109   :  { %v1044_v34 = vadd.f32 %v1043_v37, %v995_v49  ;;  %v948_v8 = vadd.f32 %v947_v41, %v3503_v16  ;;  %v996_v22 = vpop.f32.mrf.mxu1  ;;  %v1097_v44 = vpop.f32.mrf.mxu3  ;;  %v2583_v49 = vld [vmem:[%s4185_s1 + $0xcc] sm:$0xf] }
 0x10b   :  { %v3719_v58 = vadd.f32 %v1092_v10, %v1044_v34  ;;  %v997_v9 = vadd.f32 %v996_v22, %v948_v8  ;;  %v2157_v10 = vor.u32 %v2583_v49, %v2154_v21 }
 0x10d   :  { %1495 = vmatpush.bf16.msrb.mxu3 %v2157_v10 }
 0x110   :  { %v1045_v42 = vpop.f32.mrf.mxu2  ;;  %v950_v37 = vpop.f32.mrf.mxu0 }
 0x111   :  { %v1046_v45 = vadd.f32 %v1045_v42, %v997_v9  ;;  %v951_v15 = vadd.f32 %v950_v37, %v3503_v16  ;;  %v999_v34 = vpop.f32.mrf.mxu1  ;;  %v1099_v41 = vpop.f32.mrf.mxu3  ;;  %v2285_v9 = vor.u32 %v2615_v59, %v2282_v36  ;;  %v3749_v42 = vperm.slane %v3491_v11, 1  ;;  %v2138_v11 = vld [vmem:[%s4185_s1 + $0xb8] sm:$0xf0] }
 0x113   :  { %v3734_v8 = vadd.f32 %v1094_v7, %v1046_v45  ;;  %v1000_v22 = vadd.f32 %v999_v34, %v951_v15  ;;  %1194 = vmatmul.bf16.gmra.mxu0 %v3474_v2  ;;  %v2647_v15 = vld [vmem:[%s4185_s1 + $0x2cc] sm:$0xf]  ;;  %v2410_v34 = vld [vmem:[%s4185_s1 + $0x2d8] sm:$0xf0] }
 0x114   :  { %1243 = vmatmul.bf16.gmra.mxu1 %v3476_v6  ;;  %1544 = vmatpush.bf16.msrb.mxu0 %v2285_v9  ;;  %v2413_v59 = vor.u32 %v2647_v15, %v2410_v34  ;;  %v2474_v34 = vld [vmem:[%s4185_s1 + $0x358] sm:$0xf0] }
 0x115   :  { %4189 = vst [vmem:[#allocation2_spill] sm:$0xff] %v3734_v8  ;;  %2509 = vmatmul.msk.bf16.gmra.mxu2 %vm881_vm0, %v3423_v32 }
 0x116   :  { %1306 = vmatmul.bf16.vlgmr.msra.gmra.mxu3 %v3054_v46  ;;  %1593 = vmatpush.bf16.msrb.mxu1 %v2413_v59 }
 0x118   :  { %v1048_v7 = vpop.f32.mrf.mxu2  ;;  %v952_v49 = vpop.f32.mrf.mxu0 }
 0x119   :  { %v1049_v12 = vadd.f32 %v1048_v7, %v1000_v22  ;;  %v953_v21 = vadd.f32 %v952_v49, %v3503_v16  ;;  %v1001_v10 = vpop.f32.mrf.mxu1  ;;  %v1111_v45 = vpop.f32.mrf.mxu3  ;;  %v2579_v16 = vld [vmem:[%s4185_s1 + $0xac] sm:$0xf] }
 0x11a   :  { %v1112_v36 = vadd.f32 %v1111_v45, %v3749_v42  ;;  %v2663_v45 = vld [vmem:[%s4185_s1 + $0x34c] sm:$0xf] }
 0x11b   :  { %v3751_v37 = vadd.f32 %v1097_v44, %v1049_v12  ;;  %v1002_v22 = vadd.f32 %v1001_v10, %v953_v21  ;;  %v2141_v44 = vor.u32 %v2579_v16, %v2138_v11 }
 0x11d   :  { %4190 = vst [vmem:[#allocation3_spill] sm:$0xff] %v3751_v37  ;;  %1496 = vmatpush.bf16.msrb.mxu3 %v2141_v44 }
 0x120   :  { %v1050_v7 = vpop.f32.mrf.mxu2  ;;  %v1160_v12 = vpop.f32.mrf.mxu0 }
 0x121   :  { %v1051_v9 = vadd.f32 %v1050_v7, %v1002_v22  ;;  %v1113_v49 = vpop.f32.mrf.mxu3  ;;  %v1161_v37 = vadd.f32 %v1160_v12, %v1112_v36  ;;  %v1209_v21 = vpop.f32.mrf.mxu1  ;;  %v2477_v22 = vor.u32 %v2663_v45, %v2474_v34  ;;  %v2394_v45 = vld [vmem:[%s4185_s1 + $0x2b8] sm:$0xf0] }
 0x122   :  { %v1114_v59 = vadd.f32 %v1113_v49, %v3749_v42 }
 0x123   :  { %v3766_v10 = vadd.f32 %v1099_v41, %v1051_v9  ;;  %v1210_v15 = vadd.f32 %v1209_v21, %v1161_v37  ;;  %1355 = vmatmul.bf16.vlgmr.msra.gmra.mxu0 %v3065_v51  ;;  %v2611_v41 = vld [vmem:[%s4185_s1 + $0x1ac] sm:$0xf]  ;;  %v2266_v37 = vld [vmem:[%s4185_s1 + $0x1b8] sm:$0xf0]  ;;  %1646 = vmatpush.bf16.msrb.mxu2 %v2477_v22 }
 0x124   :  { %1404 = vmatmul.bf16.vlgmr.msra.gmra.mxu1 %v3067_v52  ;;  %v2269_v11 = vor.u32 %v2611_v41, %v2266_v37  ;;  %v2643_v21 = vld [vmem:[%s4185_s1 + $0x2ac] sm:$0xf]  ;;  %v2122_v22 = vld [vmem:[%s4185_s1 + $0x98] sm:$0xf0] }
 0x125   :  { %4191 = vst [vmem:[#allocation4_spill] sm:$0xff] %v3766_v10  ;;  %2510 = vmatmul.msk.bf16.vlgmr.msra.gmra.mxu2 %vm881_vm0, %v2954_v0  ;;  %v2397_v49 = vor.u32 %v2643_v21, %v2394_v45  ;;  %v2250_v45 = vld [vmem:[%s4185_s1 + $0x198] sm:$0xf0] }
 0x126   :  { %1311 = vmatmul.bf16.gmra.mxu3 %v3124_v14  ;;  %1545 = vmatpush.bf16.msrb.mxu0 %v2269_v11 }
 0x127   :  { %1594 = vmatpush.bf16.msrb.mxu1 %v2397_v49 }
 0x128   :  { %v1258_v16 = vpop.f32.mrf.mxu2  ;;  %v1162_v36 = vpop.f32.mrf.mxu0 }
 0x129   :  { %v3786_v44 = vadd.f32 %v1258_v16, %v1210_v15  ;;  %v1116_v7 = vpop.f32.mrf.mxu3  ;;  %v1163_v9 = vadd.f32 %v1162_v36, %v1114_v59  ;;  %v1211_v12 = vpop.f32.mrf.mxu1  ;;  %v2575_v15 = vld [vmem:[%s4185_s1 + $0x8c] sm:$0xf] }
 0x12a   :  { %v2125_v41 = vor.u32 %v2575_v15, %v2122_v22  ;;  %v1117_v37 = vadd.f32 %v1116_v7, %v3749_v42  ;;  %v2607_v7 = vld [vmem:[%s4185_s1 + $0x18c] sm:$0xf] }
 0x12b   :  { %4192 = vst [vmem:[#allocation5_spill] sm:$0xff] %v3786_v44  ;;  %v1212_v34 = vadd.f32 %v1211_v12, %v1163_v9  ;;  %v2253_v15 = vor.u32 %v2607_v7, %v2250_v45 }
 0x12c   :  { %1497 = vmatpush.bf16.msrb.mxu3 %v2125_v41 }
 0x12d   :  { %1546 = vmatpush.bf16.msrb.mxu0 %v2253_v15 }
 0x130   :  { %v1260_v59 = vpop.f32.mrf.mxu2  ;;  %v1165_v11 = vpop.f32.mrf.mxu0 }
 0x131   :  { %v3801_v16 = vadd.f32 %v1260_v59, %v1212_v34  ;;  %v1118_v36 = vpop.f32.mrf.mxu3  ;;  %v1166_v9 = vadd.f32 %v1165_v11, %v1117_v37  ;;  %v1214_v12 = vpop.f32.mrf.mxu1 }
 0x132   :  { %v1119_v34 = vadd.f32 %v1118_v36, %v3749_v42  ;;  %v2571_v36 = vld [vmem:[%s4185_s1 + $0x6c] sm:$0xf] }
 0x133   :  { %4193 = vst [vmem:[#allocation6_spill] sm:$0xff] %v3801_v16  ;;  %v1215_v21 = vadd.f32 %v1214_v12, %v1166_v9  ;;  %1360 = vmatmul.bf16.gmra.mxu0 %v3132_v17  ;;  %v2639_v9 = vld [vmem:[%s4185_s1 + $0x28c] sm:$0xf]  ;;  %v2378_v12 = vld [vmem:[%s4185_s1 + $0x298] sm:$0xf0] }
 0x134   :  { %1409 = vmatmul.bf16.gmra.mxu1 %v3134_v18  ;;  %v2381_v44 = vor.u32 %v2639_v9, %v2378_v12  ;;  %v2603_v12 = vld [vmem:[%s4185_s1 + $0x16c] sm:$0xf] }
 0x135   :  { %2511 = vmatmul.msk.bf16.gmra.mxu2 %vm881_vm0, %v3075_v56 }
 0x136   :  { %1316 = vmatmul.bf16.gmra.mxu3 %v3179_v35  ;;  %1595 = vmatpush.bf16.msrb.mxu1 %v2381_v44  ;;  %v2659_v44 = vld [vmem:[%s4185_s1 + $0x32c] sm:$0xf] }
 0x138   :  { %v1263_v49 = vpop.f32.mrf.mxu2  ;;  %v1167_v41 = vpop.f32.mrf.mxu0 }
 0x139   :  { %v3815_v22 = vadd.f32 %v1263_v49, %v1215_v21  ;;  %v1121_v37 = vpop.f32.mrf.mxu3  ;;  %v1168_v59 = vadd.f32 %v1167_v41, %v1119_v34  ;;  %v1216_v11 = vpop.f32.mrf.mxu1  ;;  %v2106_v21 = vld [vmem:[%s4185_s1 + $0x78] sm:$0xf0] }
 0x13a   :  { %v2109_v7 = vor.u32 %v2571_v36, %v2106_v21  ;;  %v1122_v45 = vadd.f32 %v1121_v37, %v3749_v42  ;;  %v2234_v36 = vld [vmem:[%s4185_s1 + $0x178] sm:$0xf0] }
 0x13b   :  { %4194 = vst [vmem:[#allocation7_spill] sm:$0xff] %v3815_v22  ;;  %v1217_v16 = vadd.f32 %v1216_v11, %v1168_v59 }
 0x13c   :  { %1498 = vmatpush.bf16.msrb.mxu3 %v2109_v7 }
 0x140   :  { %v1265_v34 = vpop.f32.mrf.mxu2  ;;  %v1170_v15 = vpop.f32.mrf.mxu0 }
 0x141   :  { %v3830_v49 = vadd.f32 %v1265_v34, %v1217_v16  ;;  %v1123_v41 = vpop.f32.mrf.mxu3  ;;  %v1171_v59 = vadd.f32 %v1170_v15, %v1122_v45  ;;  %v1219_v11 = vpop.f32.mrf.mxu1  ;;  %v2458_v16 = vld [vmem:[%s4185_s1 + $0x338] sm:$0xf0]  ;;  %v2237_v45 = vor.u32 %v2603_v12, %v2234_v36 }
 0x142   :  { %v2461_v37 = vor.u32 %v2659_v44, %v2458_v16  ;;  %v1124_v21 = vadd.f32 %v1123_v41, %v3749_v42  ;;  %v2635_v16 = vld [vmem:[%s4185_s1 + $0x26c] sm:$0xf] }
 0x143   :  { %4195 = vst [vmem:[#allocation8_spill] sm:$0xff] %v3830_v49  ;;  %v1220_v9 = vadd.f32 %v1219_v11, %v1171_v59  ;;  %1365 = vmatmul.bf16.gmra.mxu0 %v3187_v38  ;;  %v2362_v49 = vld [vmem:[%s4185_s1 + $0x278] sm:$0xf0] }
 0x144   :  { %1414 = vmatmul.bf16.gmra.mxu1 %v3189_v39  ;;  %1647 = vmatpush.bf16.msrb.mxu2 %v2461_v37  ;;  %v2365_v41 = vor.u32 %v2635_v16, %v2362_v49  ;;  %v2090_v37 = vld [vmem:[%s4185_s1 + $0x58] sm:$0xf0] }
 0x145   :  { %2512 = vmatmul.msk.bf16.gmra.mxu2 %vm881_vm0, %v3136_v19  ;;  %1547 = vmatpush.bf16.msrb.mxu0 %v2237_v45 }
 0x146   :  { %1321 = vmatmul.bf16.gmra.mxu3 %v3240_v63  ;;  %1596 = vmatpush.bf16.msrb.mxu1 %v2365_v41 }
 0x148   :  { %v1268_v7 = vpop.f32.mrf.mxu2  ;;  %v1172_v15 = vpop.f32.mrf.mxu0 }
 0x149   :  { %v3850_v34 = vadd.f32 %v1268_v7, %v1220_v9  ;;  %v1126_v59 = vpop.f32.mrf.mxu3  ;;  %v1173_v11 = vadd.f32 %v1172_v15, %v1124_v21  ;;  %v1221_v44 = vpop.f32.mrf.mxu1  ;;  %v2567_v9 = vld [vmem:[%s4185_s1 + $0x4c] sm:$0xf] }
 0x14a   :  { %v2093_v12 = vor.u32 %v2567_v9, %v2090_v37  ;;  %v1127_v36 = vadd.f32 %v1126_v59, %v3749_v42  ;;  %v2599_v59 = vld [vmem:[%s4185_s1 + $0x14c] sm:$0xf] }
 0x14b   :  { %4196 = vst [vmem:[#allocation9_spill] sm:$0xff] %v3850_v34  ;;  %v1222_v22 = vadd.f32 %v1221_v44, %v1173_v11 }
 0x14c   :  { %1499 = vmatpush.bf16.msrb.mxu3 %v2093_v12 }
 0x150   :  { %v1270_v21 = vpop.f32.mrf.mxu2  ;;  %v1175_v45 = vpop.f32.mrf.mxu0 }
 0x151   :  { %v3865_v7 = vadd.f32 %v1270_v21, %v1222_v22  ;;  %v1128_v15 = vpop.f32.mrf.mxu3  ;;  %v1176_v11 = vadd.f32 %v1175_v45, %v1127_v36  ;;  %v1224_v49 = vpop.f32.mrf.mxu1  ;;  %v2218_v22 = vld [vmem:[%s4185_s1 + $0x158] sm:$0xf0] }
 0x152   :  { %v1129_v16 = vadd.f32 %v1128_v15, %v3749_v42  ;;  %v2221_v9 = vor.u32 %v2599_v59, %v2218_v22  ;;  %v2563_v15 = vld [vmem:[%s4185_s1 + $0x2c] sm:$0xf] }
 0x153   :  { %4197 = vst [vmem:[#allocation10_spill] sm:$0xff] %v3865_v7  ;;  %v1225_v44 = vadd.f32 %v1224_v49, %v1176_v11  ;;  %1370 = vmatmul.bf16.gmra.mxu0 %v3248_v3  ;;  %v2631_v11 = vld [vmem:[%s4185_s1 + $0x24c] sm:$0xf]  ;;  %v2346_v49 = vld [vmem:[%s4185_s1 + $0x258] sm:$0xf0] }
 0x154   :  { %1419 = vmatmul.bf16.gmra.mxu1 %v3250_v4  ;;  %1548 = vmatpush.bf16.msrb.mxu0 %v2221_v9  ;;  %v2349_v34 = vor.u32 %v2631_v11, %v2346_v49  ;;  %v2595_v49 = vld [vmem:[%s4185_s1 + $0x12c] sm:$0xf] }
 0x155   :  { %2513 = vmatmul.msk.bf16.gmra.mxu2 %vm881_vm0, %v3191_v40 }
 0x156   :  { %1326 = vmatmul.bf16.gmra.mxu3 %v3295_v25  ;;  %1597 = vmatpush.bf16.msrb.mxu1 %v2349_v34  ;;  %v2655_v34 = vld [vmem:[%s4185_s1 + $0x30c] sm:$0xf] }
 0x158   :  { %v1273_v41 = vpop.f32.mrf.mxu2  ;;  %v1177_v12 = vpop.f32.mrf.mxu0 }
 0x159   :  { %v3879_v37 = vadd.f32 %v1273_v41, %v1225_v44  ;;  %v1131_v36 = vpop.f32.mrf.mxu3  ;;  %v1178_v21 = vadd.f32 %v1177_v12, %v1129_v16  ;;  %v1226_v45 = vpop.f32.mrf.mxu1  ;;  %v2074_v44 = vld [vmem:[%s4185_s1 + $0x38] sm:$0xf0] }
 0x15a   :  { %v2077_v59 = vor.u32 %v2563_v15, %v2074_v44  ;;  %v1132_v22 = vadd.f32 %v1131_v36, %v3749_v42  ;;  %v2202_v15 = vld [vmem:[%s4185_s1 + $0x138] sm:$0xf0] }
 0x15b   :  { %4198 = vst [vmem:[#allocation11_spill] sm:$0xff] %v3879_v37  ;;  %v1227_v7 = vadd.f32 %v1226_v45, %v1178_v21 }
 0x15c   :  { %1500 = vmatpush.bf16.msrb.mxu3 %v2077_v59 }
 0x160   :  { %v1275_v16 = vpop.f32.mrf.mxu2  ;;  %v1180_v9 = vpop.f32.mrf.mxu0 }
 0x161   :  { %v3894_v41 = vadd.f32 %v1275_v16, %v1227_v7  ;;  %v1133_v12 = vpop.f32.mrf.mxu3  ;;  %v1181_v21 = vadd.f32 %v1180_v9, %v1132_v22  ;;  %v1229_v45 = vpop.f32.mrf.mxu1  ;;  %v2442_v7 = vld [vmem:[%s4185_s1 + $0x318] sm:$0xf0]  ;;  %v2205_v22 = vor.u32 %v2595_v49, %v2202_v15 }
 0x162   :  { %v2445_v36 = vor.u32 %v2655_v34, %v2442_v7  ;;  %v1134_v44 = vadd.f32 %v1133_v12, %v3749_v42  ;;  %v2627_v7 = vld [vmem:[%s4185_s1 + $0x22c] sm:$0xf] }
 0x163   :  { %4199 = vst [vmem:[#allocation12_spill] sm:$0xff] %v3894_v41  ;;  %v1230_v11 = vadd.f32 %v1229_v45, %v1181_v21  ;;  %1375 = vmatmul.bf16.gmra.mxu0 %v3303_v28  ;;  %v2330_v41 = vld [vmem:[%s4185_s1 + $0x238] sm:$0xf0] }
 0x164   :  { %1424 = vmatmul.bf16.gmra.mxu1 %v3305_v29  ;;  %1648 = vmatpush.bf16.msrb.mxu2 %v2445_v36  ;;  %v2333_v12 = vor.u32 %v2627_v7, %v2330_v41  ;;  %v2058_v36 = vld [vmem:[%s4185_s1 + $0x18] sm:$0xf0] }
 0x165   :  { %2514 = vmatmul.msk.bf16.gmra.mxu2 %vm881_vm0, %v3252_v5  ;;  %1549 = vmatpush.bf16.msrb.mxu0 %v2205_v22 }
 0x166   :  { %1331 = vmatmul.bf16.gmra.mxu3 %v3356_v57  ;;  %1598 = vmatpush.bf16.msrb.mxu1 %v2333_v12 }
 0x168   :  { %v1278_v59 = vpop.f32.mrf.mxu2  ;;  %v1182_v9 = vpop.f32.mrf.mxu0 }
 0x169   :  { %v3914_v16 = vadd.f32 %v1278_v59, %v1230_v11  ;;  %v1136_v21 = vpop.f32.mrf.mxu3  ;;  %v1183_v45 = vadd.f32 %v1182_v9, %v1134_v44  ;;  %v1231_v34 = vpop.f32.mrf.mxu1  ;;  %v2559_v11 = vld [vmem:[%s4185_s1 + $0xc] sm:$0xf] }
 0x16a   :  { %v2061_v49 = vor.u32 %v2559_v11, %v2058_v36  ;;  %v1137_v15 = vadd.f32 %v1136_v21, %v3749_v42  ;;  %v2591_v21 = vld [vmem:[%s4185_s1 + $0x10c] sm:$0xf] }
 0x16b   :  { %4200 = vst [vmem:[#allocation13_spill] sm:$0xff] %v3914_v16  ;;  %v1232_v37 = vadd.f32 %v1231_v34, %v1183_v45 }
 0x16c   :  { %1501 = vmatpush.bf16.msrb.mxu3 %v2061_v49 }
 0x170   :  { %v1280_v44 = vpop.f32.mrf.mxu2  ;;  %v1185_v22 = vpop.f32.mrf.mxu0 }
 0x171   :  { %v3929_v59 = vadd.f32 %v1280_v44, %v1232_v37  ;;  %v1138_v9 = vpop.f32.mrf.mxu3  ;;  %v1186_v45 = vadd.f32 %v1185_v22, %v1137_v15  ;;  %v1234_v41 = vpop.f32.mrf.mxu1  ;;  %v2186_v37 = vld [vmem:[%s4185_s1 + $0x118] sm:$0xf0] }
 0x172   :  { %v1139_v7 = vadd.f32 %v1138_v9, %v3749_v42  ;;  %v2189_v11 = vor.u32 %v2591_v21, %v2186_v37 }
 0x173   :  { %4201 = vst [vmem:[#allocation14_spill] sm:$0xff] %v3929_v59  ;;  %v1235_v34 = vadd.f32 %v1234_v41, %v1186_v45  ;;  %1380 = vmatmul.bf16.gmra.mxu0 %v3364_v60  ;;  %v2623_v45 = vld [vmem:[%s4185_s1 + $0x20c] sm:$0xf]  ;;  %v2314_v41 = vld [vmem:[%s4185_s1 + $0x218] sm:$0xf0] }
 0x174   :  { %1429 = vmatmul.bf16.gmra.mxu1 %v3366_v61  ;;  %1550 = vmatpush.bf16.msrb.mxu0 %v2189_v11  ;;  %v2317_v16 = vor.u32 %v2623_v45, %v2314_v41 }
 0x175   :  { %2515 = vmatmul.msk.bf16.gmra.mxu2 %vm881_vm0, %v3307_v30 }
 0x176   :  { %1336 = vmatmul.bf16.gmra.mxu3 %v3411_v23  ;;  %1599 = vmatpush.bf16.msrb.mxu1 %v2317_v16 }
 0x178   :  { %v1283_v12 = vpop.f32.mrf.mxu2  ;;  %v1187_v49 = vpop.f32.mrf.mxu0 }
 0x179   :  { %v3943_v36 = vadd.f32 %v1283_v12, %v1235_v34  ;;  %v1141_v15 = vpop.f32.mrf.mxu3  ;;  %v1188_v44 = vadd.f32 %v1187_v49, %v1139_v7  ;;  %v1236_v22 = vpop.f32.mrf.mxu1 }
 0x17a   :  { %v1142_v9 = vadd.f32 %v1141_v15, %v3749_v42 }
 0x17b   :  { %4202 = vst [vmem:[#allocation15_spill] sm:$0xff] %v3943_v36  ;;  %v1237_v59 = vadd.f32 %v1236_v22, %v1188_v44 }
 0x180   :  { %v1285_v34 = vpop.f32.mrf.mxu2  ;;  %v1190_v37 = vpop.f32.mrf.mxu0 }
 0x181   :  { %v3952_v21 = vadd.f32 %v1285_v34, %v1237_v59  ;;  %v1143_v7 = vpop.f32.mrf.mxu3  ;;  %v1191_v12 = vadd.f32 %v1190_v37, %v1142_v9  ;;  %v1239_v11 = vpop.f32.mrf.mxu1 }
 0x182   :  { %v1144_v15 = vadd.f32 %v1143_v7, %v3749_v42 }
 0x183   :  { %4203 = vst [vmem:[#allocation16_spill] sm:$0xff] %v3952_v21  ;;  %v1240_v49 = vadd.f32 %v1239_v11, %v1191_v12  ;;  %1385 = vmatmul.bf16.gmra.mxu0 %v3419_v27 }
 0x184   :  { %1434 = vmatmul.bf16.gmra.mxu1 %v3421_v31 }
 0x185   :  { %2516 = vmatmul.msk.bf16.gmra.mxu2 %vm881_vm0, %v3368_v62 }
 0x186   :  { %1341 = vmatmul.bf16.gmra.mxu3 %v3472_v1 }
 0x188   :  { %v1288_v16 = vpop.f32.mrf.mxu2  ;;  %v1192_v59 = vpop.f32.mrf.mxu0 }
 0x189   :  { %v3960_v44 = vadd.f32 %v1288_v16, %v1240_v49  ;;  %v1146_v22 = vpop.f32.mrf.mxu3  ;;  %v1193_v45 = vadd.f32 %v1192_v59, %v1144_v15  ;;  %v1241_v41 = vpop.f32.mrf.mxu1 }
 0x18a   :  { %v1147_v34 = vadd.f32 %v1146_v22, %v3749_v42 }
 0x18b   :  { %v1242_v9 = vadd.f32 %v1241_v41, %v1193_v45 }
 0x190   :  { %v1290_v37 = vpop.f32.mrf.mxu2  ;;  %v1195_v11 = vpop.f32.mrf.mxu0 }
 0x191   :  { %v3963_v12 = vadd.f32 %v1290_v37, %v1242_v9  ;;  %v1148_v21 = vpop.f32.mrf.mxu3  ;;  %v1196_v36 = vadd.f32 %v1195_v11, %v1147_v34  ;;  %v1244_v10 = vpop.f32.mrf.mxu1 }
 0x192   :  { %v1149_v7 = vadd.f32 %v1148_v21, %v3749_v42 }
 0x193   :  { %v1245_v8 = vadd.f32 %v1244_v10, %v1196_v36  ;;  %1390 = vmatmul.bf16.gmra.mxu0 %v3474_v2  ;;  %v3976_v10 = vld [vmem:[%s4187_s2] sm:$0xf] }
 0x194   :  { %1439 = vmatmul.bf16.gmra.mxu1 %v3476_v6  ;;  %v3979_v36 = vperm.slane %v3976_v10, 2 }
 0x195   :  { %2517 = vmatmul.msk.bf16.gmra.mxu2 %vm881_vm0, %v3423_v32 }
 0x196   :  { %1502 = vmatmul.bf16.vlgmr.msrb.gmra.mxu3 %v3054_v46 }
 0x198   :  { %v1293_v49 = vpop.f32.mrf.mxu2  ;;  %v1197_v16 = vpop.f32.mrf.mxu0 }
 0x199   :  { %v3971_v15 = vadd.f32 %v1293_v49, %v1245_v8  ;;  %v1198_v59 = vadd.f32 %v1197_v16, %v1149_v7  ;;  %v1246_v22 = vpop.f32.mrf.mxu1  ;;  %v1307_v45 = vpop.f32.mrf.mxu3 }
 0x19a   :  { %v1308_v46 = vadd.f32 %v1307_v45, %v3979_v36 }
 0x19b   :  { %v1247_v41 = vadd.f32 %v1246_v22, %v1198_v59 }
 0x1a0   :  { %v1295_v9 = vpop.f32.mrf.mxu2  ;;  %v1356_v8 = vpop.f32.mrf.mxu0 }
 0x1a1   :  { %v3982_v42 = vadd.f32 %v1295_v9, %v1247_v41  ;;  %v1309_v21 = vpop.f32.mrf.mxu3  ;;  %v1357_v34 = vadd.f32 %v1356_v8, %v1308_v46  ;;  %v1405_v37 = vpop.f32.mrf.mxu1 }
 0x1a2   :  { %v1310_v7 = vadd.f32 %v1309_v21, %v3979_v36 }
 0x1a3   :  { %4204 = vst [vmem:[#allocation17_spill] sm:$0xff] %v3982_v42  ;;  %v1406_v11 = vadd.f32 %v1405_v37, %v1357_v34  ;;  %1551 = vmatmul.bf16.vlgmr.msrb.gmra.mxu0 %v3065_v51 }
 0x1a4   :  { %1600 = vmatmul.bf16.vlgmr.msrb.gmra.mxu1 %v3067_v52 }
 0x1a5   :  { %2518 = vmatmul.msk.bf16.vlgmr.msrb.gmra.mxu2 %vm881_vm0, %v2954_v0 }
 0x1a6   :  { %1507 = vmatmul.bf16.gmra.mxu3 %v3124_v14 }
 0x1a8   :  { %v1454_v49 = vpop.f32.mrf.mxu2  ;;  %v1358_v59 = vpop.f32.mrf.mxu0 }
 0x1a9   :  { %v1455_v16 = vadd.f32 %v1454_v49, %v1406_v11  ;;  %v1312_v22 = vpop.f32.mrf.mxu3  ;;  %v1359_v45 = vadd.f32 %v1358_v59, %v1310_v7  ;;  %v1407_v41 = vpop.f32.mrf.mxu1 }
 0x1aa   :  { %v1313_v51 = vadd.f32 %v1312_v22, %v3979_v36 }
 0x1ab   :  { %v1722_v46 = vmul.f32 0.5, %v1455_v16  ;;  %v1408_v9 = vadd.f32 %v1407_v41, %v1359_v45 }
 0x1ad   :  { %2670 = vtanh.f32 %v1722_v46 }
 0x1ae   :  { %2672 = vtanh.f32 %v3527_v55 }
 0x1b0   :  { %v1456_v8 = vpop.f32.mrf.mxu2  ;;  %v1361_v0 = vpop.f32.mrf.mxu0 }
 0x1b1   :  { %v1457_v52 = vadd.f32 %v1456_v8, %v1408_v9  ;;  %v1314_v34 = vpop.f32.mrf.mxu3  ;;  %v1362_v14 = vadd.f32 %v1361_v0, %v1313_v51  ;;  %v1410_v37 = vpop.f32.mrf.mxu1 }
 0x1b2   :  { %v1315_v59 = vadd.f32 %v1314_v34, %v3979_v36 }
 0x1b3   :  { %v2671_v21 = vpop.eup %2670  ;;  %v1724_v42 = vmul.f32 0.5, %v1457_v52  ;;  %v1411_v49 = vadd.f32 %v1410_v37, %v1362_v14  ;;  %1556 = vmatmul.bf16.gmra.mxu0 %v3132_v17 }
 0x1b4   :  { %v1786_v11 = vadd.f32 1.0, %v2671_v21  ;;  %1605 = vmatmul.bf16.gmra.mxu1 %v3134_v18  ;;  %v2673_v16 = vpop.eup %2672 }
 0x1b5   :  { %2674 = vtanh.f32 %v1724_v42  ;;  %2519 = vmatmul.msk.bf16.gmra.mxu2 %vm881_vm0, %v3075_v56 }
 0x1b6   :  { %v1818_v7 = vmul.f32 0.5, %v1786_v11  ;;  %1512 = vmatmul.bf16.gmra.mxu3 %v3179_v35  ;;  %2676 = vtanh.f32 %v3542_v26 }
 0x1b8   :  { %v3997_v55 = vmul.f32 %v2673_v16, %v1818_v7  ;;  %v1459_v22 = vpop.f32.mrf.mxu2  ;;  %v1363_v41 = vpop.f32.mrf.mxu0 }
 0x1b9   :  { %v1460_v45 = vadd.f32 %v1459_v22, %v1411_v49  ;;  %v1317_v17 = vpop.f32.mrf.mxu3  ;;  %v1364_v42 = vadd.f32 %v1363_v41, %v1315_v59  ;;  %v1412_v46 = vpop.f32.mrf.mxu1 }
 0x1ba   :  { %v1318_v35 = vadd.f32 %v1317_v17, %v3979_v36 }
 0x1bb   :  { %v2675_v18 = vpop.eup %2674  ;;  %v1726_v9 = vmul.f32 0.5, %v1460_v45  ;;  %v1413_v56 = vadd.f32 %v1412_v46, %v1364_v42 }
 0x1bc   :  { %v1788_v51 = vadd.f32 1.0, %v2675_v18  ;;  %v2677_v52 = vpop.eup %2676 }
 0x1bd   :  { %2678 = vtanh.f32 %v1726_v9 }
 0x1be   :  { %v1820_v8 = vmul.f32 0.5, %v1788_v51  ;;  %2680 = vtanh.f32 %v3556_v48 }
 0x1c0   :  { %v4002_v0 = vmul.f32 %v2677_v52, %v1820_v8  ;;  %v1461_v34 = vpop.f32.mrf.mxu2  ;;  %v1366_v14 = vpop.f32.mrf.mxu0 }
 0x1c1   :  { %v1462_v26 = vadd.f32 %v1461_v34, %v1413_v56  ;;  %v1319_v37 = vpop.f32.mrf.mxu3  ;;  %v1367_v21 = vadd.f32 %v1366_v14, %v1318_v35  ;;  %v1415_v11 = vpop.f32.mrf.mxu1 }
 0x1c2   :  { %v1320_v41 = vadd.f32 %v1319_v37, %v3979_v36 }
 0x1c3   :  { %v2679_v49 = vpop.eup %2678  ;;  %v1728_v7 = vmul.f32 0.5, %v1462_v26  ;;  %v1416_v59 = vadd.f32 %v1415_v11, %v1367_v21  ;;  %1561 = vmatmul.bf16.gmra.mxu0 %v3187_v38 }
 0x1c4   :  { %v1790_v16 = vadd.f32 1.0, %v2679_v49  ;;  %1610 = vmatmul.bf16.gmra.mxu1 %v3189_v39  ;;  %v2681_v45 = vpop.eup %2680 }
 0x1c5   :  { %2682 = vtanh.f32 %v1728_v7  ;;  %2520 = vmatmul.msk.bf16.gmra.mxu2 %vm881_vm0, %v3136_v19 }
 0x1c6   :  { %v1822_v22 = vmul.f32 0.5, %v1790_v16  ;;  %1517 = vmatmul.bf16.gmra.mxu3 %v3240_v63  ;;  %2684 = vtanh.f32 %v3571_v20 }
 0x1c8   :  { %v4010_v48 = vmul.f32 %v2681_v45, %v1822_v22  ;;  %v1464_v17 = vpop.f32.mrf.mxu2  ;;  %v1368_v46 = vpop.f32.mrf.mxu0 }
 0x1c9   :  { %v1465_v42 = vadd.f32 %v1464_v17, %v1416_v59  ;;  %v1322_v38 = vpop.f32.mrf.mxu3  ;;  %v1369_v18 = vadd.f32 %v1368_v46, %v1320_v41  ;;  %v1417_v9 = vpop.f32.mrf.mxu1 }
 0x1ca   :  { %v1323_v63 = vadd.f32 %v1322_v38, %v3979_v36 }
 0x1cb   :  { %v2683_v39 = vpop.eup %2682  ;;  %v1730_v51 = vmul.f32 0.5, %v1465_v42  ;;  %v1418_v19 = vadd.f32 %v1417_v9, %v1369_v18 }
 0x1cc   :  { %v1792_v56 = vadd.f32 1.0, %v2683_v39  ;;  %v2685_v35 = vpop.eup %2684 }
 0x1cd   :  { %2686 = vtanh.f32 %v1730_v51 }
 0x1ce   :  { %v1824_v8 = vmul.f32 0.5, %v1792_v56  ;;  %2688 = vtanh.f32 %v3591_v50 }
 0x1d0   :  { %v4015_v52 = vmul.f32 %v2685_v35, %v1824_v8  ;;  %v1466_v34 = vpop.f32.mrf.mxu2  ;;  %v1371_v26 = vpop.f32.mrf.mxu0 }
 0x1d1   :  { %v1467_v20 = vadd.f32 %v1466_v34, %v1418_v19  ;;  %v1324_v14 = vpop.f32.mrf.mxu3  ;;  %v1372_v37 = vadd.f32 %v1371_v26, %v1323_v63  ;;  %v1420_v21 = vpop.f32.mrf.mxu1 }
 0x1d2   :  { %v1325_v45 = vadd.f32 %v1324_v14, %v3979_v36 }
 0x1d3   :  { %v2687_v11 = vpop.eup %2686  ;;  %v1732_v49 = vmul.f32 0.5, %v1467_v20  ;;  %v1421_v16 = vadd.f32 %v1420_v21, %v1372_v37  ;;  %1566 = vmatmul.bf16.gmra.mxu0 %v3248_v3 }
 0x1d4   :  { %v1794_v7 = vadd.f32 1.0, %v2687_v11  ;;  %1615 = vmatmul.bf16.gmra.mxu1 %v3250_v4  ;;  %v2689_v22 = vpop.eup %2688 }
 0x1d5   :  { %2690 = vtanh.f32 %v1732_v49  ;;  %2521 = vmatmul.msk.bf16.gmra.mxu2 %vm881_vm0, %v3191_v40 }
 0x1d6   :  { %v1826_v59 = vmul.f32 0.5, %v1794_v7  ;;  %1522 = vmatmul.bf16.gmra.mxu3 %v3295_v25  ;;  %2692 = vtanh.f32 %v3606_v33 }
 0x1d8   :  { %v4023_v50 = vmul.f32 %v2689_v22, %v1826_v59  ;;  %v1469_v41 = vpop.f32.mrf.mxu2  ;;  %v1373_v42 = vpop.f32.mrf.mxu0 }
 0x1d9   :  { %v1470_v17 = vadd.f32 %v1469_v41, %v1421_v16  ;;  %v1327_v3 = vpop.f32.mrf.mxu3  ;;  %v1374_v46 = vadd.f32 %v1373_v42, %v1325_v45  ;;  %v1422_v38 = vpop.f32.mrf.mxu1 }
 0x1da   :  { %v1328_v25 = vadd.f32 %v1327_v3, %v3979_v36 }
 0x1db   :  { %v2691_v4 = vpop.eup %2690  ;;  %v1734_v18 = vmul.f32 0.5, %v1470_v17  ;;  %v1423_v40 = vadd.f32 %v1422_v38, %v1374_v46 }
 0x1dc   :  { %v1796_v9 = vadd.f32 1.0, %v2691_v4  ;;  %v2693_v51 = vpop.eup %2692 }
 0x1dd   :  { %2694 = vtanh.f32 %v1734_v18 }
 0x1de   :  { %v1828_v39 = vmul.f32 0.5, %v1796_v9  ;;  %2696 = vtanh.f32 %v3620_v53 }
 0x1e0   :  { %v4028_v56 = vmul.f32 %v2693_v51, %v1828_v39  ;;  %v1471_v19 = vpop.f32.mrf.mxu2  ;;  %v1376_v8 = vpop.f32.mrf.mxu0 }
 0x1e1   :  { %v1472_v33 = vadd.f32 %v1471_v19, %v1423_v40  ;;  %v1329_v63 = vpop.f32.mrf.mxu3  ;;  %v1377_v35 = vadd.f32 %v1376_v8, %v1328_v25  ;;  %v1425_v34 = vpop.f32.mrf.mxu1 }
 0x1e2   :  { %v1330_v49 = vadd.f32 %v1329_v63, %v3979_v36 }
 0x1e3   :  { %v2695_v20 = vpop.eup %2694  ;;  %v1736_v26 = vmul.f32 0.5, %v1472_v33  ;;  %v1426_v37 = vadd.f32 %v1425_v34, %v1377_v35  ;;  %1571 = vmatmul.bf16.gmra.mxu0 %v3303_v28 }
 0x1e4   :  { %v1798_v14 = vadd.f32 1.0, %v2695_v20  ;;  %1620 = vmatmul.bf16.gmra.mxu1 %v3305_v29  ;;  %v2697_v11 = vpop.eup %2696 }
 0x1e5   :  { %2698 = vtanh.f32 %v1736_v26  ;;  %2522 = vmatmul.msk.bf16.gmra.mxu2 %vm881_vm0, %v3252_v5 }
 0x1e6   :  { %v1830_v21 = vmul.f32 0.5, %v1798_v14  ;;  %1527 = vmatmul.bf16.gmra.mxu3 %v3356_v57  ;;  %2700 = vtanh.f32 %v3635_v24 }
 0x1e8   :  { %v4036_v53 = vmul.f32 %v2697_v11, %v1830_v21  ;;  %v1474_v7 = vpop.f32.mrf.mxu2  ;;  %v1378_v59 = vpop.f32.mrf.mxu0 }
 0x1e9   :  { %v1475_v16 = vadd.f32 %v1474_v7, %v1426_v37  ;;  %v1332_v28 = vpop.f32.mrf.mxu3  ;;  %v1379_v22 = vadd.f32 %v1378_v59, %v1330_v49  ;;  %v1427_v45 = vpop.f32.mrf.mxu1 }
 0x1ea   :  { %v1333_v57 = vadd.f32 %v1332_v28, %v3979_v36 }
 0x1eb   :  { %v2699_v29 = vpop.eup %2698  ;;  %v1738_v41 = vmul.f32 0.5, %v1475_v16  ;;  %v1428_v5 = vadd.f32 %v1427_v45, %v1379_v22 }
 0x1ec   :  { %v1800_v17 = vadd.f32 1.0, %v2699_v29  ;;  %v2701_v3 = vpop.eup %2700 }
 0x1ed   :  { %2702 = vtanh.f32 %v1738_v41 }
 0x1ee   :  { %v1832_v42 = vmul.f32 0.5, %v1800_v17  ;;  %2704 = vtanh.f32 %v3655_v47 }
 0x1f0   :  { %v4041_v46 = vmul.f32 %v2701_v3, %v1832_v42  ;;  %v1476_v38 = vpop.f32.mrf.mxu2  ;;  %v1381_v4 = vpop.f32.mrf.mxu0 }
 0x1f1   :  { %v1477_v24 = vadd.f32 %v1476_v38, %v1428_v5  ;;  %v1334_v18 = vpop.f32.mrf.mxu3  ;;  %v1382_v9 = vadd.f32 %v1381_v4, %v1333_v57  ;;  %v1430_v40 = vpop.f32.mrf.mxu1 }
 0x1f2   :  { %v1335_v63 = vadd.f32 %v1334_v18, %v3979_v36 }
 0x1f3   :  { %v2703_v39 = vpop.eup %2702  ;;  %v1740_v25 = vmul.f32 0.5, %v1477_v24  ;;  %v1431_v19 = vadd.f32 %v1430_v40, %v1382_v9  ;;  %1576 = vmatmul.bf16.gmra.mxu0 %v3364_v60 }
 0x1f4   :  { %v1802_v51 = vadd.f32 1.0, %v2703_v39  ;;  %1625 = vmatmul.bf16.gmra.mxu1 %v3366_v61  ;;  %v2705_v8 = vpop.eup %2704 }
 0x1f5   :  { %2706 = vtanh.f32 %v1740_v25  ;;  %2523 = vmatmul.msk.bf16.gmra.mxu2 %vm881_vm0, %v3307_v30 }
 0x1f6   :  { %v1834_v33 = vmul.f32 0.5, %v1802_v51  ;;  %1532 = vmatmul.bf16.gmra.mxu3 %v3411_v23  ;;  %2708 = vtanh.f32 %v3670_v43 }
 0x1f8   :  { %v4049_v47 = vmul.f32 %v2705_v8, %v1834_v33  ;;  %v1479_v35 = vpop.f32.mrf.mxu2  ;;  %v1383_v20 = vpop.f32.mrf.mxu0 }
 0x1f9   :  { %v1480_v34 = vadd.f32 %v1479_v35, %v1431_v19  ;;  %v1337_v60 = vpop.f32.mrf.mxu3  ;;  %v1384_v26 = vadd.f32 %v1383_v20, %v1335_v63  ;;  %v1432_v14 = vpop.f32.mrf.mxu1 }
 0x1fa   :  { %v1338_v23 = vadd.f32 %v1337_v60, %v3979_v36 }
 0x1fb   :  { %v2707_v61 = vpop.eup %2706  ;;  %v1742_v37 = vmul.f32 0.5, %v1480_v34  ;;  %v1433_v30 = vadd.f32 %v1432_v14, %v1384_v26 }
 0x1fc   :  { %v1804_v21 = vadd.f32 1.0, %v2707_v61  ;;  %v2709_v49 = vpop.eup %2708 }
 0x1fd   :  { %2710 = vtanh.f32 %v1742_v37 }
 0x1fe   :  { %v1836_v11 = vmul.f32 0.5, %v1804_v21  ;;  %2712 = vtanh.f32 %v3684_v13 }
 0x200   :  { %v4054_v7 = vmul.f32 %v2709_v49, %v1836_v11  ;;  %v1481_v16 = vpop.f32.mrf.mxu2  ;;  %v1386_v59 = vpop.f32.mrf.mxu0  ;;  %v4205_v11 = vld [vmem:[#allocation2_spill] sm:$0xff] }
 0x201   :  { %v1482_v43 = vadd.f32 %v1481_v16, %v1433_v30  ;;  %v1339_v28 = vpop.f32.mrf.mxu3  ;;  %v1387_v22 = vadd.f32 %v1386_v59, %v1338_v23  ;;  %v1435_v45 = vpop.f32.mrf.mxu1 }
 0x202   :  { %v1340_v3 = vadd.f32 %v1339_v28, %v3979_v36 }
 0x203   :  { %v2711_v29 = vpop.eup %2710  ;;  %v1744_v41 = vmul.f32 0.5, %v1482_v43  ;;  %v1436_v5 = vadd.f32 %v1435_v45, %v1387_v22  ;;  %1581 = vmatmul.bf16.gmra.mxu0 %v3419_v27 }
 0x204   :  { %v1806_v17 = vadd.f32 1.0, %v2711_v29  ;;  %1630 = vmatmul.bf16.gmra.mxu1 %v3421_v31  ;;  %v2713_v57 = vpop.eup %2712 }
 0x205   :  { %2714 = vtanh.f32 %v1744_v41  ;;  %2524 = vmatmul.msk.bf16.gmra.mxu2 %vm881_vm0, %v3368_v62 }
 0x206   :  { %v1838_v42 = vmul.f32 0.5, %v1806_v17  ;;  %1537 = vmatmul.bf16.gmra.mxu3 %v3472_v1  ;;  %2716 = vtanh.f32 %v3699_v54 }
 0x208   :  { %v4062_v13 = vmul.f32 %v2713_v57, %v1838_v42  ;;  %v1484_v38 = vpop.f32.mrf.mxu2  ;;  %v1388_v4 = vpop.f32.mrf.mxu0 }
 0x209   :  { %v1485_v24 = vadd.f32 %v1484_v38, %v1436_v5  ;;  %v1342_v27 = vpop.f32.mrf.mxu3  ;;  %v1389_v18 = vadd.f32 %v1388_v4, %v1340_v3  ;;  %v1437_v9 = vpop.f32.mrf.mxu1  ;;  %v4206_v5 = vld [vmem:[#allocation3_spill] sm:$0xff] }
 0x20a   :  { %v1343_v1 = vadd.f32 %v1342_v27, %v3979_v36 }
 0x20b   :  { %v2715_v31 = vpop.eup %2714  ;;  %v1746_v40 = vmul.f32 0.5, %v1485_v24  ;;  %v1438_v62 = vadd.f32 %v1437_v9, %v1389_v18 }
 0x20c   :  { %v1808_v39 = vadd.f32 1.0, %v2715_v31  ;;  %v2717_v51 = vpop.eup %2716 }
 0x20d   :  { %2718 = vtanh.f32 %v1746_v40 }
 0x20e   :  { %v1840_v25 = vmul.f32 0.5, %v1808_v39  ;;  %2720 = vtanh.f32 %v3719_v58 }
 0x210   :  { %v4067_v19 = vmul.f32 %v2717_v51, %v1840_v25  ;;  %v1486_v33 = vpop.f32.mrf.mxu2  ;;  %v1391_v8 = vpop.f32.mrf.mxu0 }
 0x211   :  { %v1487_v54 = vadd.f32 %v1486_v33, %v1438_v62  ;;  %v1344_v63 = vpop.f32.mrf.mxu3  ;;  %v1392_v35 = vadd.f32 %v1391_v8, %v1343_v1  ;;  %v1440_v34 = vpop.f32.mrf.mxu1  ;;  %v4207_v62 = vld [vmem:[#allocation4_spill] sm:$0xff] }
 0x212   :  { %v1345_v21 = vadd.f32 %v1344_v63, %v3979_v36 }
 0x213   :  { %v2719_v20 = vpop.eup %2718  ;;  %v1748_v60 = vmul.f32 0.5, %v1487_v54  ;;  %v1441_v14 = vadd.f32 %v1440_v34, %v1392_v35  ;;  %1586 = vmatmul.bf16.gmra.mxu0 %v3474_v2  ;;  %v4079_v2 = vperm.slane %v3976_v10, 3 }
 0x214   :  { %v1810_v26 = vadd.f32 1.0, %v2719_v20  ;;  %1635 = vmatmul.bf16.gmra.mxu1 %v3476_v6  ;;  %v2721_v37 = vpop.eup %2720 }
 0x215   :  { %2722 = vtanh.f32 %v1748_v60  ;;  %2525 = vmatmul.msk.bf16.gmra.mxu2 %vm881_vm0, %v3423_v32 }
 0x216   :  { %v1842_v61 = vmul.f32 0.5, %v1810_v26  ;;  %2724 = vtanh.f32 %v4205_v11 }
 0x218   :  { %v4074_v58 = vmul.f32 %v2721_v37, %v1842_v61  ;;  %v1489_v30 = vpop.f32.mrf.mxu2  ;;  %v1393_v49 = vpop.f32.mrf.mxu0 }
 0x219   :  { %v1490_v23 = vadd.f32 %v1489_v30, %v1441_v14  ;;  %v1394_v16 = vadd.f32 %v1393_v49, %v1345_v21  ;;  %v1442_v43 = vpop.f32.mrf.mxu1  ;;  %v1503_v6 = vpop.f32.mrf.mxu3  ;;  %v4208_v21 = vld [vmem:[#allocation5_spill] sm:$0xff] }
 0x21a   :  { %v1504_v29 = vadd.f32 %v1503_v6, %v4079_v2 }
 0x21b   :  { %v2723_v59 = vpop.eup %2722  ;;  %v1750_v28 = vmul.f32 0.5, %v1490_v23  ;;  %v1443_v22 = vadd.f32 %v1442_v43, %v1394_v16 }
 0x21c   :  { %v1812_v32 = vadd.f32 1.0, %v2723_v59  ;;  %v2725_v36 = vpop.eup %2724 }
 0x21d   :  { %2726 = vtanh.f32 %v1750_v28 }
 0x21e   :  { %v1844_v45 = vmul.f32 0.5, %v1812_v32  ;;  %2728 = vtanh.f32 %v4206_v5 }
 0x220   :  { %v4082_v41 = vmul.f32 %v2725_v36, %v1844_v45  ;;  %v1491_v17 = vpop.f32.mrf.mxu2  ;;  %v1552_v57 = vpop.f32.mrf.mxu0  ;;  %v4209_v36 = vld [vmem:[#allocation6_spill] sm:$0xff] }
 0x221   :  { %v1492_v42 = vadd.f32 %v1491_v17, %v1443_v22  ;;  %v1505_v3 = vpop.f32.mrf.mxu3  ;;  %v1553_v10 = vadd.f32 %v1552_v57, %v1504_v29  ;;  %v1601_v38 = vpop.f32.mrf.mxu1 }
 0x222   :  { %v1506_v25 = vadd.f32 %v1505_v3, %v4079_v2 }
 0x223   :  { %v2727_v24 = vpop.eup %2726  ;;  %v1752_v4 = vmul.f32 0.5, %v1492_v42  ;;  %v1602_v18 = vadd.f32 %v1601_v38, %v1553_v10 }
 0x224   :  { %v1814_v27 = vadd.f32 1.0, %v2727_v24  ;;  %v2729_v31 = vpop.eup %2728 }
 0x225   :  { %2730 = vtanh.f32 %v1752_v4 }
 0x226   :  { %v1846_v9 = vmul.f32 0.5, %v1814_v27  ;;  %2732 = vtanh.f32 %v4207_v62 }
 0x228   :  { %v4085_v40 = vmul.f32 %v2729_v31, %v1846_v9  ;;  %v1650_v39 = vpop.f32.mrf.mxu2  ;;  %v1554_v51 = vpop.f32.mrf.mxu0 }
 0x229   :  { %v1651_v1 = vadd.f32 %v1650_v39, %v1602_v18  ;;  %v1508_v33 = vpop.f32.mrf.mxu3  ;;  %v1603_v54 = vpop.f32.mrf.mxu1  ;;  %v1555_v35 = vadd.f32 %v1554_v51, %v1506_v25 }
 0x22a   :  { %v1509_v60 = vadd.f32 %v1508_v33, %v4079_v2 }
 0x22b   :  { %v2731_v8 = vpop.eup %2730  ;;  %v1723_v63 = vmul.f32 0.5, %v1651_v1  ;;  %v1604_v14 = vadd.f32 %v1603_v54, %v1555_v35  ;;  %v4210_v1 = vld [vmem:[#allocation7_spill] sm:$0xff] }
 0x22c   :  { %v1816_v34 = vadd.f32 1.0, %v2731_v8  ;;  %v2733_v26 = vpop.eup %2732 }
 0x22d   :  { %2734 = vtanh.f32 %v1723_v63 }
 0x22e   :  { %v1848_v20 = vmul.f32 0.5, %v1816_v34  ;;  %2736 = vtanh.f32 %v4208_v21 }
 0x230   :  { %v4090_v61 = vmul.f32 %v2733_v26, %v1848_v20  ;;  %v1652_v37 = vpop.f32.mrf.mxu2  ;;  %v1557_v11 = vpop.f32.mrf.mxu0 }
 0x231   :  { %v1653_v30 = vadd.f32 %v1652_v37, %v1604_v14  ;;  %v1510_v23 = vpop.f32.mrf.mxu3  ;;  %v1558_v49 = vadd.f32 %v1557_v11, %v1509_v60  ;;  %v1606_v16 = vpop.f32.mrf.mxu1 }
 0x232   :  { %v1511_v17 = vadd.f32 %v1510_v23, %v4079_v2 }
 0x233   :  { %v2735_v43 = vpop.eup %2734  ;;  %v1725_v6 = vmul.f32 0.5, %v1653_v30  ;;  %v1607_v28 = vadd.f32 %v1606_v16, %v1558_v49  ;;  %v4211_v30 = vld [vmem:[#allocation8_spill] sm:$0xff] }
 0x234   :  { %v1787_v59 = vadd.f32 1.0, %v2735_v43  ;;  %v2737_v22 = vpop.eup %2736 }
 0x235   :  { %2738 = vtanh.f32 %v1725_v6 }
 0x236   :  { %v1819_v32 = vmul.f32 0.5, %v1787_v59  ;;  %2740 = vtanh.f32 %v4209_v36 }
 0x238   :  { %v1851_v45 = vmul.f32 %v2737_v22, %v1819_v32  ;;  %v1655_v29 = vpop.f32.mrf.mxu2  ;;  %v1559_v42 = vpop.f32.mrf.mxu0 }
 0x239   :  { %v1656_v5 = vadd.f32 %v1655_v29, %v1607_v28  ;;  %v1513_v3 = vpop.f32.mrf.mxu3  ;;  %v1608_v10 = vpop.f32.mrf.mxu1  ;;  %v1560_v4 = vadd.f32 %v1559_v42, %v1511_v17  ;;  %v4212_v42 = vld [vmem:[#allocation9_spill] sm:$0xff] }
 0x23a   :  { %v1882_v57 = vpack.c.bf16 %v1851_v45, %v3997_v55  ;;  %v1514_v9 = vadd.f32 %v1513_v3, %v4079_v2 }
 0x23b   :  { %v2739_v38 = vpop.eup %2738  ;;  %v1727_v24 = vmul.f32 0.5, %v1656_v5  ;;  %v1609_v39 = vadd.f32 %v1608_v10, %v1560_v4 }
 0x23c   :  { %1898 = vst [vmem:[%s4188_s3] sm:$0xff] %v1882_v57  ;;  %v1789_v27 = vadd.f32 1.0, %v2739_v38  ;;  %v2741_v31 = vpop.eup %2740 }
 0x23d   :  { %2742 = vtanh.f32 %v1727_v24 }
 0x23e   :  { %v1821_v18 = vmul.f32 0.5, %v1789_v27  ;;  %2744 = vtanh.f32 %v4210_v1  ;;  %v4213_v1 = vld [vmem:[#allocation10_spill] sm:$0xff] }
 0x240   :  { %v1853_v62 = vmul.f32 %v2741_v31, %v1821_v18  ;;  %v1657_v25 = vpop.f32.mrf.mxu2  ;;  %v1562_v51 = vpop.f32.mrf.mxu0 }
 0x241   :  { %v1658_v55 = vadd.f32 %v1657_v25, %v1609_v39  ;;  %v1515_v54 = vpop.f32.mrf.mxu3  ;;  %v1563_v8 = vadd.f32 %v1562_v51, %v1514_v9  ;;  %v1611_v63 = vpop.f32.mrf.mxu1 }
 0x242   :  { %v1883_v33 = vpack.c.bf16 %v1853_v62, %v4002_v0  ;;  %v1516_v0 = vadd.f32 %v1515_v54, %v4079_v2 }
 0x243   :  { %v2743_v35 = vpop.eup %2742  ;;  %v1729_v34 = vmul.f32 0.5, %v1658_v55  ;;  %v1612_v60 = vadd.f32 %v1611_v63, %v1563_v8 }
 0x244   :  { %1899 = vst [vmem:[%s4188_s3 + $0x8] sm:$0xff] %v1883_v33  ;;  %v1791_v20 = vadd.f32 1.0, %v2743_v35  ;;  %v2745_v14 = vpop.eup %2744 }
 0x245   :  { %2746 = vtanh.f32 %v1729_v34 }
 0x246   :  { %v1823_v26 = vmul.f32 0.5, %v1791_v20  ;;  %2748 = vtanh.f32 %v4211_v30 }
 0x248   :  { %v1855_v37 = vmul.f32 %v2745_v14, %v1823_v26  ;;  %v1660_v21 = vpop.f32.mrf.mxu2  ;;  %v1564_v23 = vpop.f32.mrf.mxu0 }
 0x249   :  { %v1661_v11 = vadd.f32 %v1660_v21, %v1612_v60  ;;  %v1518_v16 = vpop.f32.mrf.mxu3  ;;  %v1613_v43 = vpop.f32.mrf.mxu1  ;;  %v1565_v28 = vadd.f32 %v1564_v23, %v1516_v0  ;;  %v4214_v0 = vld [vmem:[#allocation11_spill] sm:$0xff] }
 0x24a   :  { %v1884_v49 = vpack.c.bf16 %v1855_v37, %v4010_v48  ;;  %v1519_v45 = vadd.f32 %v1518_v16, %v4079_v2 }
 0x24b   :  { %v2747_v6 = vpop.eup %2746  ;;  %v1731_v59 = vmul.f32 0.5, %v1661_v11  ;;  %v1614_v36 = vadd.f32 %v1613_v43, %v1565_v28 }
 0x24c   :  { %1900 = vst [vmem:[%s4188_s3 + $0x10] sm:$0xff] %v1884_v49  ;;  %v1793_v32 = vadd.f32 1.0, %v2747_v6  ;;  %v2749_v29 = vpop.eup %2748 }
 0x24d   :  { %2750 = vtanh.f32 %v1731_v59 }
 0x24e   :  { %v1825_v22 = vmul.f32 0.5, %v1793_v32  ;;  %2752 = vtanh.f32 %v4212_v42 }
 0x250   :  { %v1857_v17 = vmul.f32 %v2749_v29, %v1825_v22  ;;  %v1662_v5 = vpop.f32.mrf.mxu2  ;;  %v1567_v57 = vpop.f32.mrf.mxu0 }
 0x251   :  { %v1663_v48 = vadd.f32 %v1662_v5, %v1614_v36  ;;  %v1520_v10 = vpop.f32.mrf.mxu3  ;;  %v1568_v38 = vadd.f32 %v1567_v57, %v1519_v45  ;;  %v1616_v24 = vpop.f32.mrf.mxu1 }
 0x252   :  { %v1885_v3 = vpack.c.bf16 %v1857_v17, %v4015_v52  ;;  %v1521_v52 = vadd.f32 %v1520_v10, %v4079_v2  ;;  %v4215_v17 = vld [vmem:[#allocation12_spill] sm:$0xff] }
 0x253   :  { %v2751_v4 = vpop.eup %2750  ;;  %v1733_v27 = vmul.f32 0.5, %v1663_v48  ;;  %v1617_v9 = vadd.f32 %v1616_v24, %v1568_v38 }
 0x254   :  { %1901 = vst [vmem:[%s4188_s3 + $0x18] sm:$0xff] %v1885_v3  ;;  %v1795_v18 = vadd.f32 1.0, %v2751_v4  ;;  %v2753_v39 = vpop.eup %2752 }
 0x255   :  { %2754 = vtanh.f32 %v1733_v27 }
 0x256   :  { %v1827_v31 = vmul.f32 0.5, %v1795_v18  ;;  %2756 = vtanh.f32 %v4213_v1 }
 0x258   :  { %v1859_v62 = vmul.f32 %v2753_v39, %v1827_v31  ;;  %v1665_v25 = vpop.f32.mrf.mxu2  ;;  %v1569_v51 = vpop.f32.mrf.mxu0 }
 0x259   :  { %v1666_v55 = vadd.f32 %v1665_v25, %v1617_v9  ;;  %v1523_v54 = vpop.f32.mrf.mxu3  ;;  %v1618_v8 = vpop.f32.mrf.mxu1  ;;  %v1570_v34 = vadd.f32 %v1569_v51, %v1521_v52  ;;  %v4216_v25 = vld [vmem:[#allocation13_spill] sm:$0xff] }
 0x25a   :  { %v1886_v33 = vpack.c.bf16 %v1859_v62, %v4023_v50  ;;  %v1524_v26 = vadd.f32 %v1523_v54, %v4079_v2 }
 0x25b   :  { %v2755_v63 = vpop.eup %2754  ;;  %v1735_v35 = vmul.f32 0.5, %v1666_v55  ;;  %v1619_v37 = vadd.f32 %v1618_v8, %v1570_v34 }
 0x25c   :  { %1902 = vst [vmem:[%s4188_s3 + $0x20] sm:$0xff] %v1886_v33  ;;  %v1797_v20 = vadd.f32 1.0, %v2755_v63  ;;  %v2757_v14 = vpop.eup %2756 }
 0x25d   :  { %2758 = vtanh.f32 %v1735_v35 }
 0x25e   :  { %v1829_v60 = vmul.f32 0.5, %v1797_v20  ;;  %2760 = vtanh.f32 %v4214_v0 }
 0x260   :  { %v1861_v21 = vmul.f32 %v2757_v14, %v1829_v60  ;;  %v1667_v30 = vpop.f32.mrf.mxu2  ;;  %v1572_v11 = vpop.f32.mrf.mxu0  ;;  %v4217_v14 = vld [vmem:[#allocation14_spill] sm:$0xff] }
 0x261   :  { %v1668_v50 = vadd.f32 %v1667_v30, %v1619_v37  ;;  %v1525_v49 = vpop.f32.mrf.mxu3  ;;  %v1573_v16 = vadd.f32 %v1572_v11, %v1524_v26  ;;  %v1621_v43 = vpop.f32.mrf.mxu1 }
 0x262   :  { %v1887_v23 = vpack.c.bf16 %v1861_v21, %v4028_v56  ;;  %v1526_v56 = vadd.f32 %v1525_v49, %v4079_v2 }
 0x263   :  { %v2759_v6 = vpop.eup %2758  ;;  %v1737_v59 = vmul.f32 0.5, %v1668_v50  ;;  %v1622_v32 = vadd.f32 %v1621_v43, %v1573_v16 }
 0x264   :  { %1903 = vst [vmem:[%s4188_s3 + $0x28] sm:$0xff] %v1887_v23  ;;  %v1799_v28 = vadd.f32 1.0, %v2759_v6  ;;  %v2761_v45 = vpop.eup %2760 }
 0x265   :  { %2762 = vtanh.f32 %v1737_v59 }
 0x266   :  { %v1831_v22 = vmul.f32 0.5, %v1799_v28  ;;  %2764 = vtanh.f32 %v4215_v17 }
 0x268   :  { %v1863_v29 = vmul.f32 %v2761_v45, %v1831_v22  ;;  %v1670_v36 = vpop.f32.mrf.mxu2  ;;  %v1574_v42 = vpop.f32.mrf.mxu0  ;;  %v4218_v45 = vld [vmem:[#allocation15_spill] sm:$0xff] }
 0x269   :  { %v1671_v5 = vadd.f32 %v1670_v36, %v1622_v32  ;;  %v1528_v57 = vpop.f32.mrf.mxu3  ;;  %v1623_v3 = vpop.f32.mrf.mxu1  ;;  %v1575_v24 = vadd.f32 %v1574_v42, %v1526_v56 }
 0x26a   :  { %v1888_v48 = vpack.c.bf16 %v1863_v29, %v4036_v53  ;;  %v1529_v18 = vadd.f32 %v1528_v57, %v4079_v2 }
 0x26b   :  { %v2763_v10 = vpop.eup %2762  ;;  %v1739_v38 = vmul.f32 0.5, %v1671_v5  ;;  %v1624_v31 = vadd.f32 %v1623_v3, %v1575_v24 }
 0x26c   :  { %1904 = vst [vmem:[%s4188_s3 + $0x30] sm:$0xff] %v1888_v48  ;;  %v1801_v4 = vadd.f32 1.0, %v2763_v10  ;;  %v2765_v9 = vpop.eup %2764 }
 0x26d   :  { %2766 = vtanh.f32 %v1739_v38 }
 0x26e   :  { %v1833_v27 = vmul.f32 0.5, %v1801_v4  ;;  %2768 = vtanh.f32 %v4216_v25 }
 0x270   :  { %v1865_v39 = vmul.f32 %v2765_v9, %v1833_v27  ;;  %v1672_v62 = vpop.f32.mrf.mxu2  ;;  %v1577_v1 = vpop.f32.mrf.mxu0  ;;  %v4219_v27 = vld [vmem:[#allocation16_spill] sm:$0xff] }
 0x271   :  { %v1673_v53 = vadd.f32 %v1672_v62, %v1624_v31  ;;  %v1530_v55 = vpop.f32.mrf.mxu3  ;;  %v1578_v51 = vadd.f32 %v1577_v1, %v1529_v18  ;;  %v1626_v33 = vpop.f32.mrf.mxu1 }
 0x272   :  { %v1889_v52 = vpack.c.bf16 %v1865_v39, %v4041_v46  ;;  %v1531_v46 = vadd.f32 %v1530_v55, %v4079_v2 }
 0x273   :  { %v2767_v54 = vpop.eup %2766  ;;  %v1741_v8 = vmul.f32 0.5, %v1673_v53  ;;  %v1627_v35 = vadd.f32 %v1626_v33, %v1578_v51 }
 0x274   :  { %1905 = vst [vmem:[%s4188_s3 + $0x38] sm:$0xff] %v1889_v52  ;;  %v1803_v63 = vadd.f32 1.0, %v2767_v54  ;;  %v2769_v20 = vpop.eup %2768 }
 0x275   :  { %2770 = vtanh.f32 %v1741_v8 }
 0x276   :  { %v1835_v34 = vmul.f32 0.5, %v1803_v63  ;;  %2772 = vtanh.f32 %v4217_v14 }
 0x278   :  { %v1867_v60 = vmul.f32 %v2769_v20, %v1835_v34  ;;  %v1675_v26 = vpop.f32.mrf.mxu2  ;;  %v1579_v21 = vpop.f32.mrf.mxu0 }
 0x279   :  { %v1676_v37 = vadd.f32 %v1675_v26, %v1627_v35  ;;  %v1533_v0 = vpop.f32.mrf.mxu3  ;;  %v1628_v50 = vpop.f32.mrf.mxu1  ;;  %v1580_v49 = vadd.f32 %v1579_v21, %v1531_v46 }
 0x27a   :  { %v1890_v30 = vpack.c.bf16 %v1867_v60, %v4049_v47  ;;  %v1534_v6 = vadd.f32 %v1533_v0, %v4079_v2 }
 0x27b   :  { %v2771_v11 = vpop.eup %2770  ;;  %v1743_v23 = vmul.f32 0.5, %v1676_v37  ;;  %v1629_v28 = vadd.f32 %v1628_v50, %v1580_v49 }
 0x27c   :  { %1906 = vst [vmem:[%s4188_s3 + $0x40] sm:$0xff] %v1890_v30  ;;  %v1805_v16 = vadd.f32 1.0, %v2771_v11  ;;  %v2773_v59 = vpop.eup %2772 }
 0x27d   :  { %2774 = vtanh.f32 %v1743_v23 }
 0x27e   :  { %v1837_v43 = vmul.f32 0.5, %v1805_v16  ;;  %2776 = vtanh.f32 %v4218_v45 }
 0x280   :  { %v1869_v32 = vmul.f32 %v2773_v59, %v1837_v43  ;;  %v1677_v22 = vpop.f32.mrf.mxu2  ;;  %v1582_v29 = vpop.f32.mrf.mxu0 }
 0x281   :  { %v1678_v47 = vadd.f32 %v1677_v22, %v1629_v28  ;;  %v1535_v17 = vpop.f32.mrf.mxu3  ;;  %v1583_v56 = vadd.f32 %v1582_v29, %v1534_v6  ;;  %v1631_v5 = vpop.f32.mrf.mxu1 }
 0x282   :  { %v1891_v36 = vpack.c.bf16 %v1869_v32, %v4054_v7  ;;  %v1536_v7 = vadd.f32 %v1535_v17, %v4079_v2 }
 0x283   :  { %v2775_v42 = vpop.eup %2774  ;;  %v1745_v48 = vmul.f32 0.5, %v1678_v47  ;;  %v1632_v3 = vadd.f32 %v1631_v5, %v1583_v56 }
 0x284   :  { %1907 = vst [vmem:[%s4188_s3 + $0x48] sm:$0xff] %v1891_v36  ;;  %v1807_v57 = vadd.f32 1.0, %v2775_v42  ;;  %v2777_v38 = vpop.eup %2776 }
 0x285   :  { %2778 = vtanh.f32 %v1745_v48  ;;  %v4220_v48 = vld [vmem:[#allocation17_spill] sm:$0xff] }
 0x286   :  { %v1839_v10 = vmul.f32 0.5, %v1807_v57  ;;  %2780 = vtanh.f32 %v4219_v27 }
 0x288   :  { %v1871_v24 = vmul.f32 %v2777_v38, %v1839_v10  ;;  %v1680_v4 = vpop.f32.mrf.mxu2  ;;  %v1584_v9 = vpop.f32.mrf.mxu0 }
 0x289   :  { %v1681_v18 = vadd.f32 %v1680_v4, %v1632_v3  ;;  %v1633_v39 = vpop.f32.mrf.mxu1  ;;  %v1585_v53 = vadd.f32 %v1584_v9, %v1536_v7  ;;  %v1538_v52 = vpop.f32.mrf.mxu3 }
 0x28a   :  { %v1892_v31 = vpack.c.bf16 %v1871_v24, %v4062_v13  ;;  %v1539_v51 = vadd.f32 %v1538_v52, %v4079_v2 }
 0x28b   :  { %v2779_v62 = vpop.eup %2778  ;;  %v1747_v25 = vmul.f32 0.5, %v1681_v18  ;;  %v1634_v54 = vadd.f32 %v1633_v39, %v1585_v53 }
 0x28c   :  { %1908 = vst [vmem:[%s4188_s3 + $0x50] sm:$0xff] %v1892_v31  ;;  %v1809_v1 = vadd.f32 1.0, %v2779_v62  ;;  %v2781_v33 = vpop.eup %2780 }
 0x28d   :  { %2782 = vtanh.f32 %v1747_v25 }
 0x28e   :  { %v1841_v55 = vmul.f32 0.5, %v1809_v1  ;;  %2784 = vtanh.f32 %v3960_v44 }
 0x290   :  { %v1873_v8 = vmul.f32 %v2781_v33, %v1841_v55  ;;  %v1682_v63 = vpop.f32.mrf.mxu2  ;;  %v1587_v35 = vpop.f32.mrf.mxu0 }
 0x291   :  { %v1683_v13 = vadd.f32 %v1682_v63, %v1634_v54  ;;  %v1588_v20 = vadd.f32 %v1587_v35, %v1539_v51  ;;  %v1636_v46 = vpop.f32.mrf.mxu1  ;;  %v1540_v30 = vpop.f32.mrf.mxu3 }
 0x292   :  { %v1893_v34 = vpack.c.bf16 %v1873_v8, %v4067_v19  ;;  %v1541_v19 = vadd.f32 %v1540_v30, %v4079_v2 }
 0x293   :  { %v2783_v60 = vpop.eup %2782  ;;  %v1749_v26 = vmul.f32 0.5, %v1683_v13  ;;  %v1637_v37 = vadd.f32 %v1636_v46, %v1588_v20 }
 0x294   :  { %1909 = vst [vmem:[%s4188_s3 + $0x58] sm:$0xff] %v1893_v34  ;;  %v1811_v14 = vadd.f32 1.0, %v2783_v60  ;;  %v2785_v0 = vpop.eup %2784 }
 0x295   :  { %2786 = vtanh.f32 %v1749_v26 }
 0x296   :  { %v1843_v21 = vmul.f32 0.5, %v1811_v14  ;;  %2788 = vtanh.f32 %v3963_v12 }
 0x298   :  { %v1875_v50 = vmul.f32 %v2785_v0, %v1843_v21  ;;  %v1685_v44 = vpop.f32.mrf.mxu2  ;;  %v1589_v23 = vpop.f32.mrf.mxu0 }
 0x299   :  { %v1686_v11 = vadd.f32 %v1685_v44, %v1637_v37  ;;  %v1590_v6 = vadd.f32 %v1589_v23, %v1541_v19  ;;  %v1638_v32 = vpop.f32.mrf.mxu1 }
 0x29a   :  { %v1894_v49 = vpack.c.bf16 %v1875_v50, %v4074_v58 }
 0x29b   :  { %v2787_v16 = vpop.eup %2786  ;;  %v1751_v43 = vmul.f32 0.5, %v1686_v11  ;;  %v1639_v45 = vadd.f32 %v1638_v32, %v1590_v6 }
 0x29c   :  { %1910 = vst [vmem:[%s4188_s3 + $0x60] sm:$0xff] %v1894_v49  ;;  %v1813_v59 = vadd.f32 1.0, %v2787_v16  ;;  %v2789_v22 = vpop.eup %2788 }
 0x29d   :  { %2790 = vtanh.f32 %v1751_v43 }
 0x29e   :  { %v1845_v28 = vmul.f32 0.5, %v1813_v59  ;;  %2792 = vtanh.f32 %v3971_v15 }
 0x2a0   :  { %v1877_v12 = vmul.f32 %v2789_v22, %v1845_v28  ;;  %v1687_v47 = vpop.f32.mrf.mxu2 }
 0x2a1   :  { %v1688_v2 = vadd.f32 %v1687_v47, %v1639_v45 }
 0x2a2   :  { %v1895_v58 = vpack.c.bf16 %v1877_v12, %v4082_v41 }
 0x2a3   :  { %v2791_v29 = vpop.eup %2790  ;;  %v1753_v36 = vmul.f32 0.5, %v1688_v2 }
 0x2a4   :  { %1911 = vst [vmem:[%s4188_s3 + $0x68] sm:$0xff] %v1895_v58  ;;  %v1815_v17 = vadd.f32 1.0, %v2791_v29  ;;  %v2793_v5 = vpop.eup %2792 }
 0x2a5   :  { %2794 = vtanh.f32 %v1753_v36 }
 0x2a6   :  { %v1847_v56 = vmul.f32 0.5, %v1815_v17  ;;  %2796 = vtanh.f32 %v4220_v48 }
 0x2a8   :  { %v1879_v42 = vmul.f32 %v2793_v5, %v1847_v56 }
 0x2aa   :  { %v1896_v57 = vpack.c.bf16 %v1879_v42, %v4085_v40 }
 0x2ab   :  { %v2795_v3 = vpop.eup %2794 }
 0x2ac   :  { %1912 = vst [vmem:[%s4188_s3 + $0x70] sm:$0xff] %v1896_v57  ;;  %v1817_v15 = vadd.f32 1.0, %v2795_v3  ;;  %v2797_v10 = vpop.eup %2796 }
 0x2ae   :  { %v1849_v41 = vmul.f32 0.5, %v1817_v15 }
 0x2b0   :  { %v1881_v38 = vmul.f32 %v2797_v10, %v1849_v41 }
 0x2b2   :  { %v1897_v24 = vpack.c.bf16 %v1881_v38, %v4090_v61 }
 0x2b4   :  { %1913 = vst [vmem:[%s4188_s3 + $0x78] sm:$0xff] %v1897_v24 }

</bundles_post_ra>
